<compile_context>
chip_gen: v6e
topology: v6e:2x2x1
jax: 0.10.0
libtpu: 0.0.40
codegen_flags: <defaults>
</compile_context>

<pallas_src>
import functools

import jax
import jax.numpy as jnp
from jax import lax
from jax.experimental import pallas as pl
from jax.experimental.pallas import tpu as pltpu


# ----------------------------------------------------------------------------
# Fused kernel: PCT encoder + AtlasNet decoder for one batch element.
# ----------------------------------------------------------------------------
def fused_kernel(pts_ref,
                 c1w, c1b, c2w, c2b,
                 s1qw, s1qb, s1tw, s1tb,
                 s2qw, s2qb, s2tw, s2tb,
                 fw1, fw2, fb,
                 d1wg, d1wl, d1b,
                 d2w, d2b, d3w, d3b,
                 grid_ref,
                 out_ref, *, cq):
    f32 = jnp.float32
    bf16 = jnp.bfloat16

    def mm(w, x):
        # bf16 MXU matmul with f32 accumulation (w already bf16).
        return jnp.dot(w, x.astype(bf16), preferred_element_type=f32)

    # ------------------------- PCT encoder ---------------------------------
    x = pts_ref[...]                                             # (8, N) padded channels
    h = jnp.maximum(mm(c1w[...], x) + c1b[...], 0.0)             # conv1 + ReLU (BN folded)
    h = jnp.maximum(mm(c2w[...], h) + c2b[...], 0.0)             # conv2 + ReLU

    def sa(x, qkvw, qkvb, tw, tb):
        # Fused Q/K/V projection: one (2*cq + C, C) matmul.
        qkv = mm(qkvw, x) + qkvb                                 # (2*cq + C, N)
        q = qkv[:cq]
        k = qkv[cq:2 * cq]
        v = qkv[2 * cq:]
        # energy = q^T k : contract the channel axis, no explicit transpose.
        energy = lax.dot_general(q.astype(bf16), k.astype(bf16),
                                 dimension_numbers=(((0,), (0,)), ((), ())),
                                 preferred_element_type=f32)     # (N, N)
        energy = energy - jnp.max(energy, axis=-1, keepdims=True)
        attn = jnp.exp(energy)
        attn = attn * pl.reciprocal(jnp.sum(attn, axis=-1, keepdims=True),
                                    approx=True)                 # softmax(-1)
        attn = attn * pl.reciprocal(1e-9 + jnp.sum(attn, axis=0, keepdims=True),
                                    approx=True)                 # PCT re-norm
        x_r = jnp.dot(v.astype(bf16), attn.astype(bf16),
                      preferred_element_type=f32)                # (C, N)
        t = jnp.maximum(mm(tw, x - x_r) + tb, 0.0)               # offset transform + ReLU
        return x + t

    x1 = sa(h, s1qw[...], s1qb[...], s1tw[...], s1tb[...])
    x2 = sa(x1, s2qw[...], s2qb[...], s2tw[...], s2tb[...])

    # fuse conv over concat([x1, x2]) without materializing the concat.
    fused = mm(fw1[...], x1) + mm(fw2[...], x2) + fb[...]        # (emb, N)
    fused = jnp.where(fused > 0.0, fused, 0.2 * fused)           # LeakyReLU(0.2)

    feat = jnp.max(fused, axis=-1, keepdims=True)                # (emb, 1) global max-pool

    # ------------------- AtlasNet-style decoder MLP -------------------------
    # dec1 input channels = [2D grid ; latent]; latent broadcast folded in.
    lat = jnp.dot(d1wl[...], feat.astype(bf16),
                  preferred_element_type=f32)                    # (128, 1)
    g = jnp.dot(d1wg[...], grid_ref[...].astype(bf16),
                preferred_element_type=f32)                      # (128, M)
    h1 = jnp.maximum(g + lat + d1b[...], 0.0)                    # (128, M)
    h2 = jnp.maximum(mm(d2w[...], h1) + d2b[...], 0.0)           # (64, M)
    h3 = jnp.tanh(mm(d3w[...], h2) + d3b[...])                   # (8, M) rows 3..7 are pad
    out_ref[...] = h3.astype(out_ref.dtype)


# ----------------------------------------------------------------------------
# Parameter init (deterministic, He-style).  Weights bf16, biases f32.
# ----------------------------------------------------------------------------
def _conv_params(key, cout, cin):
    kw, kb = jax.random.split(key)
    w = jax.random.normal(kw, (cout, cin), jnp.float32) * (2.0 / cin) ** 0.5
    b = jax.random.normal(kb, (cout, 1), jnp.float32) * 0.01
    return w, b


def init_params(key, c_in=3, c_hidden=64, emb=128, n_grid=64):
    keys = jax.random.split(key, 16)
    bf16 = jnp.bfloat16
    p = {}

    w, b = _conv_params(keys[0], c_hidden, c_in)
    p["conv1_w"] = jnp.pad(w, ((0, 0), (0, 8 - c_in))).astype(bf16)   # pad Cin 3 -> 8
    p["conv1_b"] = b
    w, b = _conv_params(keys[1], c_hidden, c_hidden)
    p["conv2_w"] = w.astype(bf16)
    p["conv2_b"] = b

    cq = c_hidden // 4
    for li, koff in ((1, 2), (2, 6)):
        wq, bq = _conv_params(keys[koff + 0], cq, c_hidden)
        wk, bk = _conv_params(keys[koff + 1], cq, c_hidden)
        wv, bv = _conv_params(keys[koff + 2], c_hidden, c_hidden)
        wt, bt = _conv_params(keys[koff + 3], c_hidden, c_hidden)
        p[f"sa{li}_qkv_w"] = jnp.concatenate([wq, wk, wv], axis=0).astype(bf16)
        p[f"sa{li}_qkv_b"] = jnp.concatenate([bq, bk, bv], axis=0)
        p[f"sa{li}_t_w"] = wt.astype(bf16)
        p[f"sa{li}_t_b"] = bt

    w, b = _conv_params(keys[10], emb, 2 * c_hidden)
    p["fuse_w1"] = w[:, :c_hidden].astype(bf16)
    p["fuse_w2"] = w[:, c_hidden:].astype(bf16)
    p["fuse_b"] = b

    # decoder MLP: (emb + 2) -> 128 -> 64 -> 3
    w, b = _conv_params(keys[11], 128, emb + 2)
    p["dec1_wg"] = jnp.pad(w[:, :2], ((0, 0), (0, 6))).astype(bf16)   # grid channels 2 -> 8
    p["dec1_wl"] = w[:, 2:].astype(bf16)
    p["dec1_b"] = b
    w, b = _conv_params(keys[12], 64, 128)
    p["dec2_w"] = w.astype(bf16)
    p["dec2_b"] = b
    w, b = _conv_params(keys[13], 3, 64)
    p["dec3_w"] = jnp.pad(w, ((0, 5), (0, 0))).astype(bf16)           # head rows 3 -> 8
    p["dec3_b"] = jnp.pad(b, ((0, 5), (0, 0)))

    # Static AtlasNet 2D grid, padded to 8 rows for aligned loads.
    g = int(round(n_grid ** 0.5))
    u = jnp.linspace(0.0, 1.0, g)
    uu, vv = jnp.meshgrid(u, u, indexing="ij")
    grid2 = jnp.stack([uu.ravel(), vv.ravel()], axis=0)               # (2, M)
    p["grid"] = jnp.pad(grid2, ((0, 6), (0, 0))).astype(jnp.float32)  # (8, M)
    return p


# ----------------------------------------------------------------------------
# Forward pass (EncoderDecoder.forward) — one fused pallas_call, grid over batch.
# ----------------------------------------------------------------------------
def encoder_decoder_forward(points, params, train=True):
    # TODO(synk): full PCT's sample_and_group / kNN neighbor gather omitted
    # (data-dependent gather has no clean rectangular BlockSpec); pure SA stack.
    B, c_in, N = points.shape
    pts = jnp.pad(points, ((0, 0), (0, 8 - c_in), (0, 0)))            # (B, 8, N)
    M = params["grid"].shape[1]
    c_hidden = params["conv2_w"].shape[0]
    cq = c_hidden // 4

    wlist = [
        params["conv1_w"], params["conv1_b"], params["conv2_w"], params["conv2_b"],
        params["sa1_qkv_w"], params["sa1_qkv_b"], params["sa1_t_w"], params["sa1_t_b"],
        params["sa2_qkv_w"], params["sa2_qkv_b"], params["sa2_t_w"], params["sa2_t_b"],
        params["fuse_w1"], params["fuse_w2"], params["fuse_b"],
        params["dec1_wg"], params["dec1_wl"], params["dec1_b"],
        params["dec2_w"], params["dec2_b"], params["dec3_w"], params["dec3_b"],
        params["grid"],
    ]
    w_specs = [pl.BlockSpec(w.shape, lambda i: (0, 0)) for w in wlist]

    out = pl.pallas_call(
        functools.partial(fused_kernel, cq=cq),
        out_shape=jax.ShapeDtypeStruct((B, 8, M), jnp.float32),
        grid=(B,),
        in_specs=[pl.BlockSpec((None, 8, N), lambda i: (i, 0, 0))] + w_specs,
        out_specs=pl.BlockSpec((None, 8, M), lambda i: (i, 0, 0)),
        compiler_params=pltpu.CompilerParams(dimension_semantics=("parallel",)),
    )(pts, *wlist)
    return out[:, :3, :]                                              # drop padded rows


# ----------------------------------------------------------------------------
if __name__ == "__main__":
    key = jax.random.PRNGKey(0)
    k_pts, k_par = jax.random.split(key)

    B, C_IN, N = 2, 3, 64
    points = jax.random.normal(k_pts, (B, C_IN, N), jnp.float32)       # (B, 3, N)
    params = init_params(k_par, c_in=C_IN, c_hidden=64, emb=128, n_grid=64)

    fwd = jax.jit(lambda p, w: encoder_decoder_forward(p, w))
    out = fwd(points, params)
    out = jax.block_until_ready(out)
    assert out.shape == (B, 3, 64), out.shape
    assert bool(jnp.all(jnp.isfinite(out)))
    print("KERNEL_OK")
</pallas_src>

<mosaic_0001>
module attributes {stable_mosaic.version = 11 : i64} {
  func.func @fused_kernel(%arg0: i32, %arg1: memref<1x8x64xf32, #tpu.memory_space<vmem>>, %arg2: memref<64x8xbf16, #tpu.memory_space<vmem>>, %arg3: memref<64x1xf32, #tpu.memory_space<vmem>>, %arg4: memref<64x64xbf16, #tpu.memory_space<vmem>>, %arg5: memref<64x1xf32, #tpu.memory_space<vmem>>, %arg6: memref<96x64xbf16, #tpu.memory_space<vmem>>, %arg7: memref<96x1xf32, #tpu.memory_space<vmem>>, %arg8: memref<64x64xbf16, #tpu.memory_space<vmem>>, %arg9: memref<64x1xf32, #tpu.memory_space<vmem>>, %arg10: memref<96x64xbf16, #tpu.memory_space<vmem>>, %arg11: memref<96x1xf32, #tpu.memory_space<vmem>>, %arg12: memref<64x64xbf16, #tpu.memory_space<vmem>>, %arg13: memref<64x1xf32, #tpu.memory_space<vmem>>, %arg14: memref<128x64xbf16, #tpu.memory_space<vmem>>, %arg15: memref<128x64xbf16, #tpu.memory_space<vmem>>, %arg16: memref<128x1xf32, #tpu.memory_space<vmem>>, %arg17: memref<128x8xbf16, #tpu.memory_space<vmem>>, %arg18: memref<128x128xbf16, #tpu.memory_space<vmem>>, %arg19: memref<128x1xf32, #tpu.memory_space<vmem>>, %arg20: memref<64x128xbf16, #tpu.memory_space<vmem>>, %arg21: memref<64x1xf32, #tpu.memory_space<vmem>>, %arg22: memref<8x64xbf16, #tpu.memory_space<vmem>>, %arg23: memref<8x1xf32, #tpu.memory_space<vmem>>, %arg24: memref<8x64xf32, #tpu.memory_space<vmem>>, %arg25: memref<1x8x64xf32, #tpu.memory_space<vmem>>) attributes {dimension_semantics = [#tpu.dimension_semantics<parallel>], iteration_bounds = array<i64: 2>, scalar_prefetch = 0 : i64, scratch_operands = 0 : i64, tpu.core_type = #tpu.core_type<tc>, window_params = [{transform_indices = @transform_0, window_bounds = array<i64: 1, 8, 64>}, {pipeline_mode = #tpu.pipeline_mode<synchronous>, transform_indices = @transform_1, window_bounds = array<i64: 64, 8>}, {pipeline_mode = #tpu.pipeline_mode<synchronous>, transform_indices = @transform_2, window_bounds = array<i64: 64, 1>}, {pipeline_mode = #tpu.pipeline_mode<synchronous>, transform_indices = @transform_3, window_bounds = array<i64: 64, 64>}, {pipeline_mode = #tpu.pipeline_mode<synchronous>, transform_indices = @transform_4, window_bounds = array<i64: 64, 1>}, {pipeline_mode = #tpu.pipeline_mode<synchronous>, transform_indices = @transform_5, window_bounds = array<i64: 96, 64>}, {pipeline_mode = #tpu.pipeline_mode<synchronous>, transform_indices = @transform_6, window_bounds = array<i64: 96, 1>}, {pipeline_mode = #tpu.pipeline_mode<synchronous>, transform_indices = @transform_7, window_bounds = array<i64: 64, 64>}, {pipeline_mode = #tpu.pipeline_mode<synchronous>, transform_indices = @transform_8, window_bounds = array<i64: 64, 1>}, {pipeline_mode = #tpu.pipeline_mode<synchronous>, transform_indices = @transform_9, window_bounds = array<i64: 96, 64>}, {pipeline_mode = #tpu.pipeline_mode<synchronous>, transform_indices = @transform_10, window_bounds = array<i64: 96, 1>}, {pipeline_mode = #tpu.pipeline_mode<synchronous>, transform_indices = @transform_11, window_bounds = array<i64: 64, 64>}, {pipeline_mode = #tpu.pipeline_mode<synchronous>, transform_indices = @transform_12, window_bounds = array<i64: 64, 1>}, {pipeline_mode = #tpu.pipeline_mode<synchronous>, transform_indices = @transform_13, window_bounds = array<i64: 128, 64>}, {pipeline_mode = #tpu.pipeline_mode<synchronous>, transform_indices = @transform_14, window_bounds = array<i64: 128, 64>}, {pipeline_mode = #tpu.pipeline_mode<synchronous>, transform_indices = @transform_15, window_bounds = array<i64: 128, 1>}, {pipeline_mode = #tpu.pipeline_mode<synchronous>, transform_indices = @transform_16, window_bounds = array<i64: 128, 8>}, {pipeline_mode = #tpu.pipeline_mode<synchronous>, transform_indices = @transform_17, window_bounds = array<i64: 128, 128>}, {pipeline_mode = #tpu.pipeline_mode<synchronous>, transform_indices = @transform_18, window_bounds = array<i64: 128, 1>}, {pipeline_mode = #tpu.pipeline_mode<synchronous>, transform_indices = @transform_19, window_bounds = array<i64: 64, 128>}, {pipeline_mode = #tpu.pipeline_mode<synchronous>, transform_indices = @transform_20, window_bounds = array<i64: 64, 1>}, {pipeline_mode = #tpu.pipeline_mode<synchronous>, transform_indices = @transform_21, window_bounds = array<i64: 8, 64>}, {pipeline_mode = #tpu.pipeline_mode<synchronous>, transform_indices = @transform_22, window_bounds = array<i64: 8, 1>}, {pipeline_mode = #tpu.pipeline_mode<synchronous>, transform_indices = @transform_23, window_bounds = array<i64: 8, 64>}, {transform_indices = @transform_24, window_bounds = array<i64: 1, 8, 64>}]} {
    %c0 = arith.constant 0 : index
    %c0_0 = arith.constant 0 : index
    %c0_1 = arith.constant 0 : index
    %0 = vector.load %arg1[%c0, %c0_0, %c0_1] : memref<1x8x64xf32, #tpu.memory_space<vmem>>, vector<1x8x64xf32>
    %1 = vector.shape_cast %0 : vector<1x8x64xf32> to vector<8x64xf32>
    %c0_2 = arith.constant 0 : index
    %c0_3 = arith.constant 0 : index
    %2 = vector.load %arg2[%c0_2, %c0_3] : memref<64x8xbf16, #tpu.memory_space<vmem>>, vector<64x8xbf16>
    %3 = arith.truncf %1 : vector<8x64xf32> to vector<8x64xbf16>
    %cst = arith.constant dense<0.000000e+00> : vector<64x64xf32>
    %4 = tpu.matmul %2, %3, %cst {dimension_numbers = #tpu.dot_dimension_numbers<[1], [0], [0], [1], [0, 0, 1, 1], [], []>} : vector<64x8xbf16>, vector<8x64xbf16>, vector<64x64xf32> -> vector<64x64xf32>
    %c0_4 = arith.constant 0 : index
    %c0_5 = arith.constant 0 : index
    %5 = vector.load %arg3[%c0_4, %c0_5] : memref<64x1xf32, #tpu.memory_space<vmem>>, vector<64x1xf32>
    %6 = vector.broadcast %5 : vector<64x1xf32> to vector<64x64xf32>
    %7 = arith.addf %4, %6 : vector<64x64xf32>
    %cst_6 = arith.constant 0.000000e+00 : f32
    %8 = vector.broadcast %cst_6 : f32 to vector<64x64xf32>
    %9 = arith.maximumf %7, %8 : vector<64x64xf32>
    %c0_7 = arith.constant 0 : index
    %c0_8 = arith.constant 0 : index
    %10 = vector.load %arg4[%c0_7, %c0_8] : memref<64x64xbf16, #tpu.memory_space<vmem>>, vector<64x64xbf16>
    %11 = arith.truncf %9 : vector<64x64xf32> to vector<64x64xbf16>
    %cst_9 = arith.constant dense<0.000000e+00> : vector<64x64xf32>
    %12 = tpu.matmul %10, %11, %cst_9 {dimension_numbers = #tpu.dot_dimension_numbers<[1], [0], [0], [1], [0, 0, 1, 1], [], []>} : vector<64x64xbf16>, vector<64x64xbf16>, vector<64x64xf32> -> vector<64x64xf32>
    %c0_10 = arith.constant 0 : index
    %c0_11 = arith.constant 0 : index
    %13 = vector.load %arg5[%c0_10, %c0_11] : memref<64x1xf32, #tpu.memory_space<vmem>>, vector<64x1xf32>
    %14 = vector.broadcast %13 : vector<64x1xf32> to vector<64x64xf32>
    %15 = arith.addf %12, %14 : vector<64x64xf32>
    %cst_12 = arith.constant 0.000000e+00 : f32
    %16 = vector.broadcast %cst_12 : f32 to vector<64x64xf32>
    %17 = arith.maximumf %15, %16 : vector<64x64xf32>
    %c0_13 = arith.constant 0 : index
    %c0_14 = arith.constant 0 : index
    %18 = vector.load %arg6[%c0_13, %c0_14] : memref<96x64xbf16, #tpu.memory_space<vmem>>, vector<96x64xbf16>
    %c0_15 = arith.constant 0 : index
    %c0_16 = arith.constant 0 : index
    %19 = vector.load %arg7[%c0_15, %c0_16] : memref<96x1xf32, #tpu.memory_space<vmem>>, vector<96x1xf32>
    %c0_17 = arith.constant 0 : index
    %c0_18 = arith.constant 0 : index
    %20 = vector.load %arg8[%c0_17, %c0_18] : memref<64x64xbf16, #tpu.memory_space<vmem>>, vector<64x64xbf16>
    %c0_19 = arith.constant 0 : index
    %c0_20 = arith.constant 0 : index
    %21 = vector.load %arg9[%c0_19, %c0_20] : memref<64x1xf32, #tpu.memory_space<vmem>>, vector<64x1xf32>
    %22 = arith.truncf %17 : vector<64x64xf32> to vector<64x64xbf16>
    %cst_21 = arith.constant dense<0.000000e+00> : vector<96x64xf32>
    %23 = tpu.matmul %18, %22, %cst_21 {dimension_numbers = #tpu.dot_dimension_numbers<[1], [0], [0], [1], [0, 0, 1, 1], [], []>} : vector<96x64xbf16>, vector<64x64xbf16>, vector<96x64xf32> -> vector<96x64xf32>
    %24 = vector.broadcast %19 : vector<96x1xf32> to vector<96x64xf32>
    %25 = arith.addf %23, %24 : vector<96x64xf32>
    %26 = vector.extract_strided_slice %25 {offsets = [0, 0], sizes = [16, 64], strides = [1, 1]} : vector<96x64xf32> to vector<16x64xf32>
    %27 = vector.extract_strided_slice %25 {offsets = [16, 0], sizes = [16, 64], strides = [1, 1]} : vector<96x64xf32> to vector<16x64xf32>
    %28 = vector.extract_strided_slice %25 {offsets = [32, 0], sizes = [64, 64], strides = [1, 1]} : vector<96x64xf32> to vector<64x64xf32>
    %29 = arith.truncf %26 : vector<16x64xf32> to vector<16x64xbf16>
    %30 = arith.truncf %27 : vector<16x64xf32> to vector<16x64xbf16>
    %cst_22 = arith.constant dense<0.000000e+00> : vector<64x64xf32>
    %31 = tpu.matmul %29, %30, %cst_22 {dimension_numbers = #tpu.dot_dimension_numbers<[0], [0], [1], [1], [0, 1, 1, 1], [], []>} : vector<16x64xbf16>, vector<16x64xbf16>, vector<64x64xf32> -> vector<64x64xf32>
    %cst_23 = arith.constant dense<0xFF800000> : vector<64xf32>
    %32 = vector.multi_reduction <maximumf>, %31, %cst_23 [1] : vector<64x64xf32> to vector<64xf32>
    %33 = vector.shape_cast %32 : vector<64xf32> to vector<64x1xf32>
    %34 = vector.broadcast %33 : vector<64x1xf32> to vector<64x64xf32>
    %35 = arith.subf %31, %34 : vector<64x64xf32>
    %36 = math.exp %35 : vector<64x64xf32>
    %cst_24 = arith.constant dense<0.000000e+00> : vector<64xf32>
    %37 = vector.multi_reduction <add>, %36, %cst_24 [1] : vector<64x64xf32> to vector<64xf32>
    %38 = vector.shape_cast %37 : vector<64xf32> to vector<64x1xf32>
    %39 = tpu.reciprocal %38 {approx = true} : vector<64x1xf32> -> vector<64x1xf32>
    %40 = vector.broadcast %39 : vector<64x1xf32> to vector<64x64xf32>
    %41 = arith.mulf %36, %40 : vector<64x64xf32>
    %cst_25 = arith.constant dense<0.000000e+00> : vector<64xf32>
    %42 = vector.multi_reduction <add>, %41, %cst_25 [0] : vector<64x64xf32> to vector<64xf32>
    %43 = vector.shape_cast %42 : vector<64xf32> to vector<1x64xf32>
    %cst_26 = arith.constant 9.99999971E-10 : f32
    %44 = vector.broadcast %cst_26 : f32 to vector<1x64xf32>
    %45 = arith.addf %44, %43 : vector<1x64xf32>
    %46 = tpu.reciprocal %45 {approx = true} : vector<1x64xf32> -> vector<1x64xf32>
    %47 = vector.broadcast %46 : vector<1x64xf32> to vector<64x64xf32>
    %48 = arith.mulf %41, %47 : vector<64x64xf32>
    %49 = arith.truncf %28 : vector<64x64xf32> to vector<64x64xbf16>
    %50 = arith.truncf %48 : vector<64x64xf32> to vector<64x64xbf16>
    %cst_27 = arith.constant dense<0.000000e+00> : vector<64x64xf32>
    %51 = tpu.matmul %49, %50, %cst_27 {dimension_numbers = #tpu.dot_dimension_numbers<[1], [0], [0], [1], [0, 0, 1, 1], [], []>} : vector<64x64xbf16>, vector<64x64xbf16>, vector<64x64xf32> -> vector<64x64xf32>
    %52 = arith.subf %17, %51 : vector<64x64xf32>
    %53 = arith.truncf %52 : vector<64x64xf32> to vector<64x64xbf16>
    %cst_28 = arith.constant dense<0.000000e+00> : vector<64x64xf32>
    %54 = tpu.matmul %20, %53, %cst_28 {dimension_numbers = #tpu.dot_dimension_numbers<[1], [0], [0], [1], [0, 0, 1, 1], [], []>} : vector<64x64xbf16>, vector<64x64xbf16>, vector<64x64xf32> -> vector<64x64xf32>
    %55 = vector.broadcast %21 : vector<64x1xf32> to vector<64x64xf32>
    %56 = arith.addf %54, %55 : vector<64x64xf32>
    %cst_29 = arith.constant 0.000000e+00 : f32
    %57 = vector.broadcast %cst_29 : f32 to vector<64x64xf32>
    %58 = arith.maximumf %56, %57 : vector<64x64xf32>
    %59 = arith.addf %17, %58 : vector<64x64xf32>
    %c0_30 = arith.constant 0 : index
    %c0_31 = arith.constant 0 : index
    %60 = vector.load %arg10[%c0_30, %c0_31] : memref<96x64xbf16, #tpu.memory_space<vmem>>, vector<96x64xbf16>
    %c0_32 = arith.constant 0 : index
    %c0_33 = arith.constant 0 : index
    %61 = vector.load %arg11[%c0_32, %c0_33] : memref<96x1xf32, #tpu.memory_space<vmem>>, vector<96x1xf32>
    %c0_34 = arith.constant 0 : index
    %c0_35 = arith.constant 0 : index
    %62 = vector.load %arg12[%c0_34, %c0_35] : memref<64x64xbf16, #tpu.memory_space<vmem>>, vector<64x64xbf16>
    %c0_36 = arith.constant 0 : index
    %c0_37 = arith.constant 0 : index
    %63 = vector.load %arg13[%c0_36, %c0_37] : memref<64x1xf32, #tpu.memory_space<vmem>>, vector<64x1xf32>
    %64 = arith.truncf %59 : vector<64x64xf32> to vector<64x64xbf16>
    %cst_38 = arith.constant dense<0.000000e+00> : vector<96x64xf32>
    %65 = tpu.matmul %60, %64, %cst_38 {dimension_numbers = #tpu.dot_dimension_numbers<[1], [0], [0], [1], [0, 0, 1, 1], [], []>} : vector<96x64xbf16>, vector<64x64xbf16>, vector<96x64xf32> -> vector<96x64xf32>
    %66 = vector.broadcast %61 : vector<96x1xf32> to vector<96x64xf32>
    %67 = arith.addf %65, %66 : vector<96x64xf32>
    %68 = vector.extract_strided_slice %67 {offsets = [0, 0], sizes = [16, 64], strides = [1, 1]} : vector<96x64xf32> to vector<16x64xf32>
    %69 = vector.extract_strided_slice %67 {offsets = [16, 0], sizes = [16, 64], strides = [1, 1]} : vector<96x64xf32> to vector<16x64xf32>
    %70 = vector.extract_strided_slice %67 {offsets = [32, 0], sizes = [64, 64], strides = [1, 1]} : vector<96x64xf32> to vector<64x64xf32>
    %71 = arith.truncf %68 : vector<16x64xf32> to vector<16x64xbf16>
    %72 = arith.truncf %69 : vector<16x64xf32> to vector<16x64xbf16>
    %cst_39 = arith.constant dense<0.000000e+00> : vector<64x64xf32>
    %73 = tpu.matmul %71, %72, %cst_39 {dimension_numbers = #tpu.dot_dimension_numbers<[0], [0], [1], [1], [0, 1, 1, 1], [], []>} : vector<16x64xbf16>, vector<16x64xbf16>, vector<64x64xf32> -> vector<64x64xf32>
    %cst_40 = arith.constant dense<0xFF800000> : vector<64xf32>
    %74 = vector.multi_reduction <maximumf>, %73, %cst_40 [1] : vector<64x64xf32> to vector<64xf32>
    %75 = vector.shape_cast %74 : vector<64xf32> to vector<64x1xf32>
    %76 = vector.broadcast %75 : vector<64x1xf32> to vector<64x64xf32>
    %77 = arith.subf %73, %76 : vector<64x64xf32>
    %78 = math.exp %77 : vector<64x64xf32>
    %cst_41 = arith.constant dense<0.000000e+00> : vector<64xf32>
    %79 = vector.multi_reduction <add>, %78, %cst_41 [1] : vector<64x64xf32> to vector<64xf32>
    %80 = vector.shape_cast %79 : vector<64xf32> to vector<64x1xf32>
    %81 = tpu.reciprocal %80 {approx = true} : vector<64x1xf32> -> vector<64x1xf32>
    %82 = vector.broadcast %81 : vector<64x1xf32> to vector<64x64xf32>
    %83 = arith.mulf %78, %82 : vector<64x64xf32>
    %cst_42 = arith.constant dense<0.000000e+00> : vector<64xf32>
    %84 = vector.multi_reduction <add>, %83, %cst_42 [0] : vector<64x64xf32> to vector<64xf32>
    %85 = vector.shape_cast %84 : vector<64xf32> to vector<1x64xf32>
    %cst_43 = arith.constant 9.99999971E-10 : f32
    %86 = vector.broadcast %cst_43 : f32 to vector<1x64xf32>
    %87 = arith.addf %86, %85 : vector<1x64xf32>
    %88 = tpu.reciprocal %87 {approx = true} : vector<1x64xf32> -> vector<1x64xf32>
    %89 = vector.broadcast %88 : vector<1x64xf32> to vector<64x64xf32>
    %90 = arith.mulf %83, %89 : vector<64x64xf32>
    %91 = arith.truncf %70 : vector<64x64xf32> to vector<64x64xbf16>
    %92 = arith.truncf %90 : vector<64x64xf32> to vector<64x64xbf16>
    %cst_44 = arith.constant dense<0.000000e+00> : vector<64x64xf32>
    %93 = tpu.matmul %91, %92, %cst_44 {dimension_numbers = #tpu.dot_dimension_numbers<[1], [0], [0], [1], [0, 0, 1, 1], [], []>} : vector<64x64xbf16>, vector<64x64xbf16>, vector<64x64xf32> -> vector<64x64xf32>
    %94 = arith.subf %59, %93 : vector<64x64xf32>
    %95 = arith.truncf %94 : vector<64x64xf32> to vector<64x64xbf16>
    %cst_45 = arith.constant dense<0.000000e+00> : vector<64x64xf32>
    %96 = tpu.matmul %62, %95, %cst_45 {dimension_numbers = #tpu.dot_dimension_numbers<[1], [0], [0], [1], [0, 0, 1, 1], [], []>} : vector<64x64xbf16>, vector<64x64xbf16>, vector<64x64xf32> -> vector<64x64xf32>
    %97 = vector.broadcast %63 : vector<64x1xf32> to vector<64x64xf32>
    %98 = arith.addf %96, %97 : vector<64x64xf32>
    %cst_46 = arith.constant 0.000000e+00 : f32
    %99 = vector.broadcast %cst_46 : f32 to vector<64x64xf32>
    %100 = arith.maximumf %98, %99 : vector<64x64xf32>
    %101 = arith.addf %59, %100 : vector<64x64xf32>
    %c0_47 = arith.constant 0 : index
    %c0_48 = arith.constant 0 : index
    %102 = vector.load %arg14[%c0_47, %c0_48] : memref<128x64xbf16, #tpu.memory_space<vmem>>, vector<128x64xbf16>
    %103 = arith.truncf %59 : vector<64x64xf32> to vector<64x64xbf16>
    %cst_49 = arith.constant dense<0.000000e+00> : vector<128x64xf32>
    %104 = tpu.matmul %102, %103, %cst_49 {dimension_numbers = #tpu.dot_dimension_numbers<[1], [0], [0], [1], [0, 0, 1, 1], [], []>} : vector<128x64xbf16>, vector<64x64xbf16>, vector<128x64xf32> -> vector<128x64xf32>
    %c0_50 = arith.constant 0 : index
    %c0_51 = arith.constant 0 : index
    %105 = vector.load %arg15[%c0_50, %c0_51] : memref<128x64xbf16, #tpu.memory_space<vmem>>, vector<128x64xbf16>
    %106 = arith.truncf %101 : vector<64x64xf32> to vector<64x64xbf16>
    %cst_52 = arith.constant dense<0.000000e+00> : vector<128x64xf32>
    %107 = tpu.matmul %105, %106, %cst_52 {dimension_numbers = #tpu.dot_dimension_numbers<[1], [0], [0], [1], [0, 0, 1, 1], [], []>} : vector<128x64xbf16>, vector<64x64xbf16>, vector<128x64xf32> -> vector<128x64xf32>
    %108 = arith.addf %104, %107 : vector<128x64xf32>
    %c0_53 = arith.constant 0 : index
    %c0_54 = arith.constant 0 : index
    %109 = vector.load %arg16[%c0_53, %c0_54] : memref<128x1xf32, #tpu.memory_space<vmem>>, vector<128x1xf32>
    %110 = vector.broadcast %109 : vector<128x1xf32> to vector<128x64xf32>
    %111 = arith.addf %108, %110 : vector<128x64xf32>
    %cst_55 = arith.constant 0.000000e+00 : f32
    %112 = vector.broadcast %cst_55 : f32 to vector<128x64xf32>
    %113 = arith.cmpf ogt, %111, %112 : vector<128x64xf32>
    %cst_56 = arith.constant 2.000000e-01 : f32
    %114 = vector.broadcast %cst_56 : f32 to vector<128x64xf32>
    %115 = arith.mulf %114, %111 : vector<128x64xf32>
    %116 = arith.select %113, %111, %115 : vector<128x64xi1>, vector<128x64xf32>
    %cst_57 = arith.constant dense<0xFF800000> : vector<128xf32>
    %117 = vector.multi_reduction <maximumf>, %116, %cst_57 [1] : vector<128x64xf32> to vector<128xf32>
    %118 = vector.shape_cast %117 : vector<128xf32> to vector<128x1xf32>
    %c0_58 = arith.constant 0 : index
    %c0_59 = arith.constant 0 : index
    %119 = vector.load %arg18[%c0_58, %c0_59] : memref<128x128xbf16, #tpu.memory_space<vmem>>, vector<128x128xbf16>
    %120 = arith.truncf %118 : vector<128x1xf32> to vector<128x1xbf16>
    %cst_60 = arith.constant dense<0.000000e+00> : vector<128x1xf32>
    %121 = tpu.matmul %119, %120, %cst_60 {dimension_numbers = #tpu.dot_dimension_numbers<[1], [0], [0], [1], [0, 0, 1, 1], [], []>} : vector<128x128xbf16>, vector<128x1xbf16>, vector<128x1xf32> -> vector<128x1xf32>
    %c0_61 = arith.constant 0 : index
    %c0_62 = arith.constant 0 : index
    %122 = vector.load %arg17[%c0_61, %c0_62] : memref<128x8xbf16, #tpu.memory_space<vmem>>, vector<128x8xbf16>
    %c0_63 = arith.constant 0 : index
    %c0_64 = arith.constant 0 : index
    %123 = vector.load %arg24[%c0_63, %c0_64] : memref<8x64xf32, #tpu.memory_space<vmem>>, vector<8x64xf32>
    %124 = arith.truncf %123 : vector<8x64xf32> to vector<8x64xbf16>
    %cst_65 = arith.constant dense<0.000000e+00> : vector<128x64xf32>
    %125 = tpu.matmul %122, %124, %cst_65 {dimension_numbers = #tpu.dot_dimension_numbers<[1], [0], [0], [1], [0, 0, 1, 1], [], []>} : vector<128x8xbf16>, vector<8x64xbf16>, vector<128x64xf32> -> vector<128x64xf32>
    %126 = vector.broadcast %121 : vector<128x1xf32> to vector<128x64xf32>
    %127 = arith.addf %125, %126 : vector<128x64xf32>
    %c0_66 = arith.constant 0 : index
    %c0_67 = arith.constant 0 : index
    %128 = vector.load %arg19[%c0_66, %c0_67] : memref<128x1xf32, #tpu.memory_space<vmem>>, vector<128x1xf32>
    %129 = vector.broadcast %128 : vector<128x1xf32> to vector<128x64xf32>
    %130 = arith.addf %127, %129 : vector<128x64xf32>
    %cst_68 = arith.constant 0.000000e+00 : f32
    %131 = vector.broadcast %cst_68 : f32 to vector<128x64xf32>
    %132 = arith.maximumf %130, %131 : vector<128x64xf32>
    %c0_69 = arith.constant 0 : index
    %c0_70 = arith.constant 0 : index
    %133 = vector.load %arg20[%c0_69, %c0_70] : memref<64x128xbf16, #tpu.memory_space<vmem>>, vector<64x128xbf16>
    %134 = arith.truncf %132 : vector<128x64xf32> to vector<128x64xbf16>
    %cst_71 = arith.constant dense<0.000000e+00> : vector<64x64xf32>
    %135 = tpu.matmul %133, %134, %cst_71 {dimension_numbers = #tpu.dot_dimension_numbers<[1], [0], [0], [1], [0, 0, 1, 1], [], []>} : vector<64x128xbf16>, vector<128x64xbf16>, vector<64x64xf32> -> vector<64x64xf32>
    %c0_72 = arith.constant 0 : index
    %c0_73 = arith.constant 0 : index
    %136 = vector.load %arg21[%c0_72, %c0_73] : memref<64x1xf32, #tpu.memory_space<vmem>>, vector<64x1xf32>
    %137 = vector.broadcast %136 : vector<64x1xf32> to vector<64x64xf32>
    %138 = arith.addf %135, %137 : vector<64x64xf32>
    %cst_74 = arith.constant 0.000000e+00 : f32
    %139 = vector.broadcast %cst_74 : f32 to vector<64x64xf32>
    %140 = arith.maximumf %138, %139 : vector<64x64xf32>
    %c0_75 = arith.constant 0 : index
    %c0_76 = arith.constant 0 : index
    %141 = vector.load %arg22[%c0_75, %c0_76] : memref<8x64xbf16, #tpu.memory_space<vmem>>, vector<8x64xbf16>
    %142 = arith.truncf %140 : vector<64x64xf32> to vector<64x64xbf16>
    %cst_77 = arith.constant dense<0.000000e+00> : vector<8x64xf32>
    %143 = tpu.matmul %141, %142, %cst_77 {dimension_numbers = #tpu.dot_dimension_numbers<[1], [0], [0], [1], [0, 0, 1, 1], [], []>} : vector<8x64xbf16>, vector<64x64xbf16>, vector<8x64xf32> -> vector<8x64xf32>
    %c0_78 = arith.constant 0 : index
    %c0_79 = arith.constant 0 : index
    %144 = vector.load %arg23[%c0_78, %c0_79] : memref<8x1xf32, #tpu.memory_space<vmem>>, vector<8x1xf32>
    %145 = vector.broadcast %144 : vector<8x1xf32> to vector<8x64xf32>
    %146 = arith.addf %143, %145 : vector<8x64xf32>
    %147 = math.tanh %146 : vector<8x64xf32>
    %c0_80 = arith.constant 0 : index
    %c0_81 = arith.constant 0 : index
    %c0_82 = arith.constant 0 : index
    %148 = vector.load %arg25[%c0_80, %c0_81, %c0_82] : memref<1x8x64xf32, #tpu.memory_space<vmem>>, vector<1x8x64xf32>
    %149 = vector.shape_cast %148 : vector<1x8x64xf32> to vector<8x64xf32>
    %150 = vector.shape_cast %147 : vector<8x64xf32> to vector<1x8x64xf32>
    tpu.vector_store %arg25[%c0_80, %c0_81, %c0_82], %150 {strides = array<i32>} : memref<1x8x64xf32, #tpu.memory_space<vmem>>, vector<1x8x64xf32>,
    return
  }
  func.func @transform_0(%arg0: i32) -> (i32, i32, i32) {
    %c0_i32 = arith.constant 0 : i32
    %c0_i32_0 = arith.constant 0 : i32
    %c0_i32_1 = arith.constant 0 : i32
    return %arg0, %c0_i32, %c0_i32_0 : i32, i32, i32
  }
  func.func @transform_1(%arg0: i32) -> (i32, i32) {
    %c0_i32 = arith.constant 0 : i32
    %c0_i32_0 = arith.constant 0 : i32
    %c0_i32_1 = arith.constant 0 : i32
    return %c0_i32, %c0_i32_0 : i32, i32
  }
  func.func @transform_2(%arg0: i32) -> (i32, i32) {
    %c0_i32 = arith.constant 0 : i32
    %c0_i32_0 = arith.constant 0 : i32
    %c0_i32_1 = arith.constant 0 : i32
    return %c0_i32, %c0_i32_0 : i32, i32
  }
  func.func @transform_3(%arg0: i32) -> (i32, i32) {
    %c0_i32 = arith.constant 0 : i32
    %c0_i32_0 = arith.constant 0 : i32
    %c0_i32_1 = arith.constant 0 : i32
    return %c0_i32, %c0_i32_0 : i32, i32
  }
  func.func @transform_4(%arg0: i32) -> (i32, i32) {
    %c0_i32 = arith.constant 0 : i32
    %c0_i32_0 = arith.constant 0 : i32
    %c0_i32_1 = arith.constant 0 : i32
    return %c0_i32, %c0_i32_0 : i32, i32
  }
  func.func @transform_5(%arg0: i32) -> (i32, i32) {
    %c0_i32 = arith.constant 0 : i32
    %c0_i32_0 = arith.constant 0 : i32
    %c0_i32_1 = arith.constant 0 : i32
    return %c0_i32, %c0_i32_0 : i32, i32
  }
  func.func @transform_6(%arg0: i32) -> (i32, i32) {
    %c0_i32 = arith.constant 0 : i32
    %c0_i32_0 = arith.constant 0 : i32
    %c0_i32_1 = arith.constant 0 : i32
    return %c0_i32, %c0_i32_0 : i32, i32
  }
  func.func @transform_7(%arg0: i32) -> (i32, i32) {
    %c0_i32 = arith.constant 0 : i32
    %c0_i32_0 = arith.constant 0 : i32
    %c0_i32_1 = arith.constant 0 : i32
    return %c0_i32, %c0_i32_0 : i32, i32
  }
  func.func @transform_8(%arg0: i32) -> (i32, i32) {
    %c0_i32 = arith.constant 0 : i32
    %c0_i32_0 = arith.constant 0 : i32
    %c0_i32_1 = arith.constant 0 : i32
    return %c0_i32, %c0_i32_0 : i32, i32
  }
  func.func @transform_9(%arg0: i32) -> (i32, i32) {
    %c0_i32 = arith.constant 0 : i32
    %c0_i32_0 = arith.constant 0 : i32
    %c0_i32_1 = arith.constant 0 : i32
    return %c0_i32, %c0_i32_0 : i32, i32
  }
  func.func @transform_10(%arg0: i32) -> (i32, i32) {
    %c0_i32 = arith.constant 0 : i32
    %c0_i32_0 = arith.constant 0 : i32
    %c0_i32_1 = arith.constant 0 : i32
    return %c0_i32, %c0_i32_0 : i32, i32
  }
  func.func @transform_11(%arg0: i32) -> (i32, i32) {
    %c0_i32 = arith.constant 0 : i32
    %c0_i32_0 = arith.constant 0 : i32
    %c0_i32_1 = arith.constant 0 : i32
    return %c0_i32, %c0_i32_0 : i32, i32
  }
  func.func @transform_12(%arg0: i32) -> (i32, i32) {
    %c0_i32 = arith.constant 0 : i32
    %c0_i32_0 = arith.constant 0 : i32
    %c0_i32_1 = arith.constant 0 : i32
    return %c0_i32, %c0_i32_0 : i32, i32
  }
  func.func @transform_13(%arg0: i32) -> (i32, i32) {
    %c0_i32 = arith.constant 0 : i32
    %c0_i32_0 = arith.constant 0 : i32
    %c0_i32_1 = arith.constant 0 : i32
    return %c0_i32, %c0_i32_0 : i32, i32
  }
  func.func @transform_14(%arg0: i32) -> (i32, i32) {
    %c0_i32 = arith.constant 0 : i32
    %c0_i32_0 = arith.constant 0 : i32
    %c0_i32_1 = arith.constant 0 : i32
    return %c0_i32, %c0_i32_0 : i32, i32
  }
  func.func @transform_15(%arg0: i32) -> (i32, i32) {
    %c0_i32 = arith.constant 0 : i32
    %c0_i32_0 = arith.constant 0 : i32
    %c0_i32_1 = arith.constant 0 : i32
    return %c0_i32, %c0_i32_0 : i32, i32
  }
  func.func @transform_16(%arg0: i32) -> (i32, i32) {
    %c0_i32 = arith.constant 0 : i32
    %c0_i32_0 = arith.constant 0 : i32
    %c0_i32_1 = arith.constant 0 : i32
    return %c0_i32, %c0_i32_0 : i32, i32
  }
  func.func @transform_17(%arg0: i32) -> (i32, i32) {
    %c0_i32 = arith.constant 0 : i32
    %c0_i32_0 = arith.constant 0 : i32
    %c0_i32_1 = arith.constant 0 : i32
    return %c0_i32, %c0_i32_0 : i32, i32
  }
  func.func @transform_18(%arg0: i32) -> (i32, i32) {
    %c0_i32 = arith.constant 0 : i32
    %c0_i32_0 = arith.constant 0 : i32
    %c0_i32_1 = arith.constant 0 : i32
    return %c0_i32, %c0_i32_0 : i32, i32
  }
  func.func @transform_19(%arg0: i32) -> (i32, i32) {
    %c0_i32 = arith.constant 0 : i32
    %c0_i32_0 = arith.constant 0 : i32
    %c0_i32_1 = arith.constant 0 : i32
    return %c0_i32, %c0_i32_0 : i32, i32
  }
  func.func @transform_20(%arg0: i32) -> (i32, i32) {
    %c0_i32 = arith.constant 0 : i32
    %c0_i32_0 = arith.constant 0 : i32
    %c0_i32_1 = arith.constant 0 : i32
    return %c0_i32, %c0_i32_0 : i32, i32
  }
  func.func @transform_21(%arg0: i32) -> (i32, i32) {
    %c0_i32 = arith.constant 0 : i32
    %c0_i32_0 = arith.constant 0 : i32
    %c0_i32_1 = arith.constant 0 : i32
    return %c0_i32, %c0_i32_0 : i32, i32
  }
  func.func @transform_22(%arg0: i32) -> (i32, i32) {
    %c0_i32 = arith.constant 0 : i32
    %c0_i32_0 = arith.constant 0 : i32
    %c0_i32_1 = arith.constant 0 : i32
    return %c0_i32, %c0_i32_0 : i32, i32
  }
  func.func @transform_23(%arg0: i32) -> (i32, i32) {
    %c0_i32 = arith.constant 0 : i32
    %c0_i32_0 = arith.constant 0 : i32
    %c0_i32_1 = arith.constant 0 : i32
    return %c0_i32, %c0_i32_0 : i32, i32
  }
  func.func @transform_24(%arg0: i32) -> (i32, i32, i32) {
    %c0_i32 = arith.constant 0 : i32
    %c0_i32_0 = arith.constant 0 : i32
    %c0_i32_1 = arith.constant 0 : i32
    return %arg0, %c0_i32, %c0_i32_0 : i32, i32, i32
  }
}

</mosaic_0001>

<bundles_post_ra>
// kernel: _lambda_.1
= control target key start
LH: loop header
LB: loop body
LE: loop exit
PB: predicated region body
PF: predicated region fallthrough
CT: control target
= control target key end

     0   :  { %s5611_s0 = inlined_call_operand.vmem [shape: f32[2,8,64], index: 0, kind: input, shape index: {}]   ;;  %s5612_s1 = inlined_call_operand.vmem [shape: bf16[64,8], index: 1, kind: input, shape index: {}]   ;;  %s5613_s2 = inlined_call_operand.vmem [shape: f32[64,1], index: 2, kind: input, shape index: {}]   ;;  %s5614_s3 = inlined_call_operand.vmem [shape: bf16[64,64], index: 3, kind: input, shape index: {}]   ;;  %s5615_s4 = inlined_call_operand.vmem [shape: f32[64,1], index: 4, kind: input, shape index: {}]   ;;  %s5616_s5 = inlined_call_operand.vmem [shape: bf16[96,64], index: 5, kind: input, shape index: {}]   ;;  %s5617_s6 = inlined_call_operand.vmem [shape: f32[96,1], index: 6, kind: input, shape index: {}]   ;;  %s5618_s7 = inlined_call_operand.vmem [shape: bf16[64,64], index: 7, kind: input, shape index: {}]   ;;  %s5619_s8 = inlined_call_operand.vmem [shape: f32[64,1], index: 8, kind: input, shape index: {}]   ;;  %s5620_s9 = inlined_call_operand.vmem [shape: bf16[96,64], index: 9, kind: input, shape index: {}]   ;;  %s5621_s10 = inlined_call_operand.vmem [shape: f32[96,1], index: 10, kind: input, shape index: {}]   ;;  %s5622_s11 = inlined_call_operand.vmem [shape: bf16[64,64], index: 11, kind: input, shape index: {}]   ;;  %s5623_s12 = inlined_call_operand.vmem [shape: f32[64,1], index: 12, kind: input, shape index: {}]   ;;  %s5624_s13 = inlined_call_operand.vmem [shape: bf16[128,64], index: 13, kind: input, shape index: {}]   ;;  %s5625_s14 = inlined_call_operand.vmem [shape: bf16[128,64], index: 14, kind: input, shape index: {}]   ;;  %s5626_s15 = inlined_call_operand.vmem [shape: f32[128,1], index: 15, kind: input, shape index: {}]   ;;  %s5627_s16 = inlined_call_operand.vmem [shape: bf16[128,8], index: 16, kind: input, shape index: {}]   ;;  %s5628_s17 = inlined_call_operand.vmem [shape: bf16[128,128], index: 17, kind: input, shape index: {}]   ;;  %s5629_s18 = inlined_call_operand.vmem [shape: f32[128,1], index: 18, kind: input, shape index: {}]   ;;  %s5630_s19 = inlined_call_operand.vmem [shape: bf16[64,128], index: 19, kind: input, shape index: {}]   ;;  %s5631_s20 = inlined_call_operand.vmem [shape: f32[64,1], index: 20, kind: input, shape index: {}]   ;;  %s5632_s21 = inlined_call_operand.vmem [shape: bf16[8,64], index: 21, kind: input, shape index: {}]   ;;  %s5633_s22 = inlined_call_operand.vmem [shape: f32[8,1], index: 22, kind: input, shape index: {}]   ;;  %s5634_s23 = inlined_call_operand.vmem [shape: f32[8,64], index: 23, kind: input, shape index: {}]   ;;  %s5635_s24 = inlined_call_operand.vmem [shape: f32[2,8,64], index: 24, kind: output, shape index: {}]  }
   0x1   :  { %5650 = sst [smem:[#allocation2_spill]] %s5611_s0 }
   0x2   :  { %5651 = sst [smem:[#allocation3_spill]] %s5612_s1 }
   0x3   :  { %5652 = sst [smem:[#allocation4_spill]] %s5613_s2 }
   0x4   :  { %5653 = sst [smem:[#allocation5_spill]] %s5614_s3 }
   0x5   :  { %5654 = sst [smem:[#allocation6_spill]] %s5615_s4 }
   0x6   :  { %5655 = sst [smem:[#allocation7_spill]] %s5616_s5  ;;  %s4710_s5 = smov 0  }
   0x7   :  { %5656 = sst [smem:[#allocation8_spill]] %s5617_s6 }
   0x8   :  { %5657 = sst [smem:[#allocation9_spill]] %s5618_s7 }
   0x9   :  { %5658 = sst [smem:[#allocation10_spill]] %s5619_s8 }
   0xa LB: > { %s3858_s26 = sadd.s32 4294967295, %s4580_s5   ;;  %p3862_p0 = scmp.ge.s32.totalorder %s4580_s5, 1  ;;  %s4580_s5 = sphi %s4710_s5, %s34_s5  }
   0xb   : > { %p661_p1 = scmp.lt.s32.totalorder %s4580_s5, 3 }
   0xd   : > { %p662_p2 = pnand %p3862_p0, %p661_p1 }
   0xe   : > { %p725_p3 = scmp.lt.s32.totalorder (!%p662_p2), %s3858_s26, 1  ;;  %s5659_s6 = sld [smem:[#allocation3_spill]] (!%p662_p2) }
   0xf   : > { %665 = sbr.rel (%p662_p2) target bundleno = 4392 (0x1128), region = 116  ;;  %s5660_s7 = sld [smem:[#allocation4_spill]] (!%p662_p2) }
  0x10   : > { %s5661_s25 = sld [smem:[#allocation2_spill]] (!%p662_p2) }
  0x11   : > { %s5662_s27 = sld [smem:[#allocation6_spill]] (!%p662_p2) }
  0x12   : > { %s5664_s3 = sld [smem:[#allocation5_spill]] (!%p662_p2) }
  0x13   : > { %s5665_s30 = sld [smem:[#allocation7_spill]] (!%p662_p2) }
  0x14   : > { %v4440_v0 = vld [vmem:[%s5659_s6] sm:$0xff]   ;;  %vm812_vm0 = vcmask 64512   ;;  %s5670_s26 = smov (!%p725_p3, %s3858_s26), 1  ;;  %v4582_v1 = vmov 0   ;;  %vm825_vm1 = vcmask 1043456   ;;  %v4441_v9 = vld [vmem:[%s5659_s6 + $0x8] sm:$0xff]  }
  0x15   : > { %4143 = vmatprep.mubr.msk.bf16.mxu0 %vm812_vm0, %v4440_v0  ;;  %s5644_s2 = sshll.u32 %s5670_s26, 3  ;;  %4438 = vset.pattern.permute.xlu0 %v4582_v1  ;;  %v750_v2 = vld [vmem:[%s5660_s7 + $0x30] sm:$0xff]  ;;  %v748_v3 = vld [vmem:[%s5660_s7 + $0x20] sm:$0xff]  ;;  %v751_v5 = vld [vmem:[%s5660_s7 + $0x38] sm:$0xff]  ;;  %vm982_vm2 = vcmask 523264   ;;  %vm1319_vm3 = vcmask 130048  }
  0x16   : > { %4439 = vset.pattern.permute.xlu1 %v4582_v1  ;;  %s728_s8 = scalar_lea.vmem %s5661_s25, %s5644_s2  ;;  %784 = vperm.xlu0 %4438, %v750_v2   ;;  %v749_v7 = vld [vmem:[%s5660_s7 + $0x28] sm:$0xff]  ;;  %v4442_v10 = vld [vmem:[%s5659_s6 + $0x10] sm:$0xff]   ;;  %v747_v12 = vld [vmem:[%s5660_s7 + $0x18] sm:$0xff]  ;;  %s5667_s28 = sld [smem:[#allocation9_spill]] }
  0x17   : > { %v734_v4 = vld [vmem:[%s728_s8] sm:$0xff]  ;;  %774 = vperm.xlu1 %4439, %v748_v3   ;;  %v746_v11 = vld [vmem:[%s5660_s7 + $0x10] sm:$0xff]  ;;  %v745_v14 = vld [vmem:[%s5660_s7 + $0x8] sm:$0xff]  ;;  %s5663_s8 = sld [smem:[#allocation8_spill]] }
  0x18   : > { %v743_v6 = vpack.c.bf16 %v734_v4, %v734_v4  ;;  %v744_v13 = vld [vmem:[%s5660_s7] sm:$0xff]  ;;  %v4443_v15 = vld [vmem:[%s5659_s6 + $0x18] sm:$0xff]   ;;  %v920_v16 = vld [vmem:[%s5662_s27 + $0x30] sm:$0xff]  ;;  %s5666_s7 = sld [smem:[#allocation10_spill]] }
  0x19   : > { %v921_v17 = vld [vmem:[%s5662_s27 + $0x38] sm:$0xff]  ;;  %v918_v18 = vld [vmem:[%s5662_s27 + $0x20] sm:$0xff]  ;;  %v919_v19 = vld [vmem:[%s5662_s27 + $0x28] sm:$0xff] }
  0x1a   : > { %4425 = vmatprep.subr.msk.bf16.mxu0 %vm825_vm1, %v743_v6  ;;  %v827_v8 = vsel %vm825_vm1, %v743_v6, 0  ;;  %789 = vperm.xlu0 %4438, %v751_v5   ;;  %v916_v20 = vld [vmem:[%s5662_s27 + $0x10] sm:$0xff]  ;;  %v917_v21 = vld [vmem:[%s5662_s27 + $0x18] sm:$0xff]  ;;  %v914_v22 = vld [vmem:[%s5662_s27] sm:$0xff] }
  0x1b   : > { %4142 = vmatpush3.bf16.msra.mxu0 %v827_v8  ;;  %779 = vperm.xlu1 %4439, %v749_v7   ;;  %v915_v23 = vld [vmem:[%s5662_s27 + $0x8] sm:$0xff]  ;;  %v4444_v28 = vld [vmem:[%s5664_s3] sm:$0xff]   ;;  %v4446_v2 = vld [vmem:[%s5664_s3 + $0x10] sm:$0xff]  }
  0x1c   : > { %4159 = vmatprep.mubr.msk.bf16.mxu1 %vm982_vm2, %v4444_v28  ;;  %v4445_v1 = vld [vmem:[%s5664_s3 + $0x8] sm:$0xff]   ;;  %v4447_v3 = vld [vmem:[%s5664_s3 + $0x18] sm:$0xff]   ;;  %v4448_v4 = vld [vmem:[%s5665_s30] sm:$0xff]  }
  0x1d   : > { %v1080_v24 = vld [vmem:[%s5663_s8] sm:$0xff]  ;;  %v1081_v25 = vld [vmem:[%s5663_s8 + $0x8] sm:$0xff]  ;;  %v1082_v26 = vld [vmem:[%s5663_s8 + $0x10] sm:$0xff] }
  0x1e   : > { %4144 = vmatmul.mubr.msk.bf16.vlgmr.msra.gmra.mxu0 %vm812_vm0, %v4441_v9  ;;  %764 = vperm.xlu0 %4438, %v746_v11   ;;  %v1083_v27 = vld [vmem:[%s5663_s8 + $0x18] sm:$0xff] }
  0x1f   : > { %4147 = vmatprep.mubr.msk.bf16.mxu0 %vm812_vm0, %v4442_v10  ;;  %769 = vperm.xlu1 %4439, %v747_v12  }
  0x22   : > { %754 = vperm.xlu0 %4438, %v744_v13  }
  0x23   : > { %759 = vperm.xlu1 %4439, %v745_v14  }
  0x26   : > { %4148 = vmatmul.mubr.msk.bf16.gmra.mxu0 %vm812_vm0, %v4443_v15  ;;  %954 = vperm.xlu0 %4438, %v920_v16  }
  0x27   : > { %959 = vperm.xlu1 %4439, %v921_v17   ;;  %4175 = vmatprep.mubr.msk.bf16.mxu0 %vm982_vm2, %v4448_v4 }
  0x2a   : > { %944 = vperm.xlu0 %4438, %v918_v18  }
  0x2b   : > { %949 = vperm.xlu1 %4439, %v919_v19  }
  0x2e   : > { %934 = vperm.xlu0 %4438, %v916_v20  }
  0x2f   : > { %939 = vperm.xlu1 %4439, %v917_v21  }
  0x32   : > { %924 = vperm.xlu0 %4438, %v914_v22  }
  0x33   : > { %929 = vperm.xlu1 %4439, %v915_v23  }
  0x36   : > { %1114 = vperm.xlu0 %4438, %v1080_v24  }
  0x37   : > { %1119 = vperm.xlu1 %4439, %v1081_v25  }
  0x3a   : > { %1124 = vperm.xlu0 %4438, %v1082_v26  }
  0x3b   : > { %1129 = vperm.xlu1 %4439, %v1083_v27  }
  0x91   : > { %v785_v31 = vpop.permute.xlu0 %784 }
  0x92   : > { %v775_v29 = vpop.permute.xlu1 %774 }
  0x95   : > { %v790_v36 = vpop.permute.xlu0 %789 }
  0x96   : > { %v780_v34 = vpop.permute.xlu1 %779 }
  0x99   : > { %v765_v44 = vpop.permute.xlu0 %764 }
  0x9a   : > { %v770_v40 = vpop.permute.xlu1 %769 }
  0x9d   : > { %v755_v58 = vpop.permute.xlu0 %754 }
  0x9e   : > { %v760_v54 = vpop.permute.xlu1 %759 }
  0xa1   : > { %v955_v7 = vpop.permute.xlu0 %954 }
  0xa2   : > { %v960_v5 = vpop.permute.xlu1 %959 }
  0xa5   : > { %v945_v12 = vpop.permute.xlu0 %944 }
  0xa6   : > { %v950_v10 = vpop.permute.xlu1 %949 }
  0xa9   : > { %v935_v20 = vpop.permute.xlu0 %934 }
  0xaa   : > { %v940_v16 = vpop.permute.xlu1 %939 }
  0xde   : > { %v4145_v30 = vpop.f32.mrf.mxu0 }
  0xdf   : > { %v872_v50 = vadd.f32 %v4145_v30, %v765_v44  ;;  %v930_v30 = vpop.permute.xlu1 %929 }
  0xe0   : > { %v863_v32 = vpop.f32.mrf.mxu0 }
  0xe1   : > { %v896_v59 = vmax.f32 %v872_v50, 0.0  ;;  %v864_v60 = vadd.f32 %v863_v32, %v755_v58 }
  0xe2   : > { %v4146_v33 = vpop.f32.mrf.mxu0 }
  0xe3   : > { %v875_v46 = vadd.f32 %v4146_v33, %v770_v40  ;;  %v894_v63 = vmax.f32 %v864_v60, 0.0  ;;  %v4450_v60 = vld [vmem:[%s5665_s30 + $0x10] sm:$0xff]  }
  0xe4   : > { %v866_v35 = vpop.f32.mrf.mxu0 }
  0xe5   : > { %v897_v55 = vmax.f32 %v875_v46, 0.0  ;;  %v867_v56 = vadd.f32 %v866_v35, %v760_v54 }
  0xe6   : > { %v4149_v37 = vpop.f32.mrf.mxu0 }
  0xe7   : > { %v888_v39 = vadd.f32 %v4149_v37, %v785_v31  ;;  %v911_v61 = vpack.c.bf16 %v897_v55, %v896_v59  ;;  %v895_v62 = vmax.f32 %v867_v56, 0.0 }
  0xe8   : > { %v879_v38 = vpop.f32.mrf.mxu0 }
  0xe9   : > { %v880_v42 = vadd.f32 %v879_v38, %v775_v29  ;;  %v900_v47 = vmax.f32 %v888_v39, 0.0  ;;  %v910_v0 = vpack.c.bf16 %v895_v62, %v894_v63  ;;  %v4452_v62 = vld [vmem:[%s5665_s30 + $0x20] sm:$0xff]   ;;  %v4453_v63 = vld [vmem:[%s5665_s30 + $0x28] sm:$0xff]  }
  0xea   : > { %v4150_v41 = vpop.f32.mrf.mxu0 }
  0xeb   : > { %v891_v43 = vadd.f32 %v4150_v41, %v790_v36  ;;  %v898_v51 = vmax.f32 %v880_v42, 0.0  ;;  %v4449_v41 = vld [vmem:[%s5665_s30 + $0x8] sm:$0xff]  }
  0xec   : > { %v882_v45 = vpop.f32.mrf.mxu0 }
  0xed   : > { %v901_v48 = vmax.f32 %v891_v43, 0.0  ;;  %v883_v49 = vadd.f32 %v882_v45, %v780_v34  ;;  %v925_v34 = vpop.permute.xlu0 %924  ;;  %v1120_v43 = vpop.permute.xlu1 %1119 }
  0xef   : > { %v899_v52 = vmax.f32 %v883_v49, 0.0  ;;  %v913_v53 = vpack.c.bf16 %v901_v48, %v900_v47 }
  0xf1   : > { %v912_v57 = vpack.c.bf16 %v899_v52, %v898_v51  ;;  %4151 = vmatprep.subr.bf16.mxu1 %v913_v53  ;;  %v1115_v42 = vpop.permute.xlu0 %1114  ;;  %v1130_v47 = vpop.permute.xlu1 %1129 }
  0xf2   : > { %4152 = vmatpush3.bf16.msra.mxu1 %v913_v53 }
  0xf3   : > { %4153 = vmatprep.subr.bf16.mxu1 %v912_v57 }
  0xf5   : > { %v1125_v46 = vpop.permute.xlu0 %1124 }
  0xf6   : > { %4154 = vmatpush3.bf16.msra.mxu1 %v912_v57 }
  0xf7   : > { %4155 = vmatprep.subr.bf16.mxu1 %v911_v61 }
  0xfa   : > { %4156 = vmatpush3.bf16.msra.mxu1 %v911_v61  ;;  %v4451_v61 = vld [vmem:[%s5665_s30 + $0x18] sm:$0xff]  }
  0xfb   : > { %4157 = vmatprep.subr.bf16.mxu1 %v910_v0 }
  0xfe   : > { %4158 = vmatpush3.bf16.msra.mxu1 %v910_v0 }
 0x101   : > { %4160 = vmatmul.mubr.msk.bf16.vlgmr.msra.gmra.mxu1 %vm982_vm2, %v4445_v1 }
 0x102   : > { %4163 = vmatprep.mubr.msk.bf16.mxu1 %vm982_vm2, %v4446_v2 }
 0x109   : > { %4164 = vmatmul.mubr.msk.bf16.gmra.mxu1 %vm982_vm2, %v4447_v3 }
 0x1c1   : > { %v4161_v6 = vpop.f32.mrf.mxu1 }
 0x1c2   : > { %v1038_v26 = vadd.f32 %v4161_v6, %v935_v20 }
 0x1c3   : > { %v1029_v8 = vpop.f32.mrf.mxu1 }
 0x1c4   : > { %v4838_v35 = vmax.f32 %v1038_v26, 0.0  ;;  %v1030_v36 = vadd.f32 %v1029_v8, %v925_v34 }
 0x1c5   : > { %v4162_v9 = vpop.f32.mrf.mxu1 }
 0x1c6   : > { %v1041_v22 = vadd.f32 %v4162_v9, %v940_v16  ;;  %v4844_v39 = vmax.f32 %v1030_v36, 0.0 }
 0x1c7   : > { %v1032_v11 = vpop.f32.mrf.mxu1 }
 0x1c8   : > { %v4834_v31 = vmax.f32 %v1041_v22, 0.0  ;;  %v1033_v32 = vadd.f32 %v1032_v11, %v930_v30 }
 0x1c9   : > { %v4165_v13 = vpop.f32.mrf.mxu1 }
 0x1ca   : > { %v1054_v15 = vadd.f32 %v4165_v13, %v955_v7  ;;  %v4840_v37 = vmax.f32 %v1033_v32, 0.0  ;;  %v1109_v38 = vpack.c.bf16 %v4834_v31, %v4838_v35 }
 0x1cb   : > { %v1045_v14 = vpop.f32.mrf.mxu1 }
 0x1cc   : > { %v1046_v18 = vadd.f32 %v1045_v14, %v945_v12  ;;  %v4824_v23 = vmax.f32 %v1054_v15, 0.0  ;;  %v1108_v40 = vpack.c.bf16 %v4840_v37, %v4844_v39 }
 0x1cd   : > { %v4166_v17 = vpop.f32.mrf.mxu1 }
 0x1ce   : > { %v1057_v19 = vadd.f32 %v4166_v17, %v960_v5  ;;  %v4828_v27 = vmax.f32 %v1046_v18, 0.0 }
 0x1cf   : > { %v1048_v21 = vpop.f32.mrf.mxu1 }
 0x1d0   : > { %v4826_v24 = vmax.f32 %v1057_v19, 0.0  ;;  %v1049_v25 = vadd.f32 %v1048_v21, %v950_v10 }
 0x1d2   : > { %v4830_v28 = vmax.f32 %v1049_v25, 0.0  ;;  %v1111_v29 = vpack.c.bf16 %v4826_v24, %v4824_v23 }
 0x1d4   : > { %4167 = vmatprep.subr.bf16.mxu0 %v1111_v29  ;;  %v1110_v33 = vpack.c.bf16 %v4830_v28, %v4828_v27 }
 0x1d5   : > { %4168 = vmatpush3.bf16.msra.mxu0 %v1111_v29 }
 0x1d6   : > { %4169 = vmatprep.subr.bf16.mxu0 %v1110_v33 }
 0x1d9   : > { %4170 = vmatpush3.bf16.msra.mxu0 %v1110_v33 }
 0x1da   : > { %4171 = vmatprep.subr.bf16.mxu0 %v1109_v38 }
 0x1dd   : > { %4172 = vmatpush3.bf16.msra.mxu0 %v1109_v38 }
 0x1de   : > { %4173 = vmatprep.subr.bf16.mxu0 %v1108_v40 }
 0x1e1   : > { %4174 = vmatpush3.bf16.msra.mxu0 %v1108_v40 }
 0x1e4   : > { %4176 = vmatmul.mubr.msk.bf16.vlgmr.msra.gmra.mxu0 %vm982_vm2, %v4449_v41 }
 0x1e5   : > { %4179 = vmatprep.mubr.msk.bf16.mxu0 %vm982_vm2, %v4450_v60 }
 0x1ec   : > { %4180 = vmatmul.mubr.msk.bf16.gmra.mxu0 %vm982_vm2, %v4451_v61 }
 0x1ed   : > { %4183 = vmatprep.mubr.msk.bf16.mxu0 %vm982_vm2, %v4452_v62 }
 0x1f4   : > { %4184 = vmatmul.mubr.msk.bf16.gmra.mxu0 %vm982_vm2, %v4453_v63 }
 0x2a4   : > { %v4177_v44 = vpop.f32.mrf.mxu0 }
 0x2a5   : > { %v1263_v49 = vadd.f32 %v4177_v44, %v1125_v46 }
 0x2a6   : > { %v1254_v45 = vpop.f32.mrf.mxu0 }
 0x2a7   : > { %v1255_v52 = vadd.f32 %v1254_v45, %v1115_v42 }
 0x2a8   : > { %v4178_v48 = vpop.f32.mrf.mxu0 }
 0x2a9   : > { %v1266_v50 = vadd.f32 %v4178_v48, %v1130_v47 }
 0x2aa   : > { %v1257_v51 = vpop.f32.mrf.mxu0 }
 0x2ab   : > { %v1302_v53 = vpack.c.bf16 %v1266_v50, %v1263_v49  ;;  %v1258_v54 = vadd.f32 %v1257_v51, %v1120_v43 }
 0x2ad   : > { %v1301_v55 = vpack.c.bf16 %v1258_v54, %v1255_v52  ;;  %4187 = vmatprep.subr.bf16.mxu1 %v1302_v53 }
 0x2ae   : > { %4188 = vmatpush3.bf16.msra.mxu1 %v1302_v53 }
 0x2af   : > { %1303 = vxpose.xlu0.c.b16.start.end [1/1] (short) (narrow) %v1301_v55, 64 }
 0x311   : > { %v1311_v56 = vpop.trf.xlu0 }
 0x312   : > { %4189 = vmatprep.mubr.msk.bf16.mxu1 %vm1319_vm3, %v1311_v56 }
 0x315   : > { %v1312_v57 = vpop.trf.xlu0 }
 0x316   : > { %4190 = vmatmul.mubr.msk.bf16.vlgmr.msra.gmra.mxu1 %vm1319_vm3, %v1312_v57 }
 0x319   : > { %v1313_v58 = vpop.trf.xlu0 }
 0x31a   : > { %4193 = vmatprep.mubr.msk.bf16.mxu1 %vm1319_vm3, %v1313_v58 }
 0x31d   : > { %v1314_v59 = vpop.trf.xlu0 }
 0x31e   : > { %4194 = vmatmul.mubr.msk.bf16.gmra.mxu1 %vm1319_vm3, %v1314_v59 }
 0x3d6   : > { %v4191_v0 = vpop.f32.mrf.mxu1 }
 0x3d7   : > { %v1403_v5 = vsel %vm982_vm2, %v4191_v0, -inf }
 0x3d8   : > { %v1366_v1 = vpop.f32.mrf.mxu1 }
 0x3d9   : > { %v1397_v2 = vsel %vm982_vm2, %v1366_v1, -inf }
 0x3da   : > { %1398 = vmax.xlane.f32.xlu1 %v1397_v2  ;;  %v4192_v3 = vpop.f32.mrf.mxu1  ;;  %v1085_v2 = vld [vmem:[%s5663_s8 + $0x28] sm:$0xff] }
 0x3db   : > { %v1406_v9 = vsel %vm982_vm2, %v4192_v3, -inf }
 0x3dc   : > { %v1369_v4 = vpop.f32.mrf.mxu1 }
 0x3dd   : > { %v1400_v6 = vsel %vm982_vm2, %v1369_v4, -inf }
 0x3de   : > { %1404 = vmax.xlane.f32.xlu1 %v1403_v5  ;;  %1401 = vmax.xlane.f32.xlu0 %v1400_v6  ;;  %v4195_v7 = vpop.f32.mrf.mxu1  ;;  %v1089_v5 = vld [vmem:[%s5663_s8 + $0x48] sm:$0xff]  ;;  %v1090_v6 = vld [vmem:[%s5663_s8 + $0x50] sm:$0xff] }
 0x3df   : > { %v1415_v15 = vsel %vm982_vm2, %v4195_v7, -inf }
 0x3e0   : > { %v1382_v8 = vpop.f32.mrf.mxu1 }
 0x3e1   : > { %v1409_v12 = vsel %vm982_vm2, %v1382_v8, -inf }
 0x3e2   : > { %1407 = vmax.xlane.f32.xlu1 %v1406_v9  ;;  %v4196_v10 = vpop.f32.mrf.mxu1  ;;  %v1107_v9 = vld [vmem:[%s5666_s7 + $0x38] sm:$0xff] }
 0x3e3   : > { %v1418_v11 = vsel %vm982_vm2, %v4196_v10, -inf }
 0x3e4   : > { %1419 = vmax.xlane.f32.xlu0 %v1418_v11  ;;  %v1385_v13 = vpop.f32.mrf.mxu1  ;;  %v1105_v11 = vld [vmem:[%s5666_s7 + $0x28] sm:$0xff] }
 0x3e5   : > { %v1412_v14 = vsel %vm982_vm2, %v1385_v13, -inf }
 0x3e6   : > { %1410 = vmax.xlane.f32.xlu1 %v1409_v12  ;;  %v1102_v12 = vld [vmem:[%s5666_s7 + $0x10] sm:$0xff] }
 0x3ea   : > { %1413 = vmax.xlane.f32.xlu1 %v1412_v14  ;;  %v1100_v14 = vld [vmem:[%s5666_s7] sm:$0xff] }
 0x3ee   : > { %1416 = vmax.xlane.f32.xlu1 %v1415_v15  ;;  %v1101_v15 = vld [vmem:[%s5666_s7 + $0x8] sm:$0xff] }
 0x463   : > { %v1399_v16 = vpop.xlane.xlu1 %1398 }
 0x464   : > { %v1421_v17 = vsub.f32 %v1366_v1, %v1399_v16  ;;  %v1086_v1 = vld [vmem:[%s5663_s8 + $0x30] sm:$0xff]  ;;  %v1778_v16 = vld [vmem:[%s5621_s10] sm:$0xff] }
 0x466   : > { %v1429_v18 = vmul.f32 1.442695, %v1421_v17  ;;  %v1779_v17 = vld [vmem:[%s5621_s10 + $0x8] sm:$0xff] }
 0x467   : > { %v1405_v19 = vpop.xlane.xlu1 %1404  ;;  %v1402_v20 = vpop.xlane.xlu0 %1401 }
 0x468   : > { %4504 = vpow2.f32 %v1429_v18  ;;  %v1423_v21 = vsub.f32 %v4191_v0, %v1405_v19  ;;  %v1422_v22 = vsub.f32 %v1369_v4, %v1402_v20  ;;  %v1084_v0 = vld [vmem:[%s5663_s8 + $0x20] sm:$0xff]  ;;  %v1780_v18 = vld [vmem:[%s5621_s10 + $0x10] sm:$0xff]  ;;  %v1781_v19 = vld [vmem:[%s5621_s10 + $0x18] sm:$0xff] }
 0x469   : > { %v1088_v4 = vld [vmem:[%s5663_s8 + $0x40] sm:$0xff] }
 0x46a   : > { %v1433_v25 = vmul.f32 1.442695, %v1423_v21  ;;  %v1431_v26 = vmul.f32 1.442695, %v1422_v22 }
 0x46b   : > { %v1408_v29 = vpop.xlane.xlu1 %1407 }
 0x46c   : > { %4506 = vpow2.f32 %v1433_v25  ;;  %v1424_v30 = vsub.f32 %v4192_v3, %v1408_v29  ;;  %v1087_v3 = vld [vmem:[%s5663_s8 + $0x38] sm:$0xff]  ;;  %v4972_v29 = vpop.f32.mrf.mxu0 }
 0x46d   : > { %4508 = vpow2.f32 %v1431_v26  ;;  %v1420_v33 = vpop.xlane.xlu0 %1419 }
 0x46e   : > { %v1435_v32 = vmul.f32 1.442695, %v1424_v30  ;;  %v1428_v38 = vsub.f32 %v4196_v10, %v1420_v33  ;;  %v1104_v10 = vld [vmem:[%s5666_s7 + $0x20] sm:$0xff]  ;;  %v1270_v33 = vpop.f32.mrf.mxu0 }
 0x46f   : > { %v1411_v34 = vpop.xlane.xlu1 %1410 }
 0x470   : > { %4510 = vpow2.f32 %v1435_v32  ;;  %v1425_v36 = vsub.f32 %v1382_v8, %v1411_v34  ;;  %v1443_v44 = vmul.f32 1.442695, %v1428_v38  ;;  %v1106_v8 = vld [vmem:[%s5666_s7 + $0x30] sm:$0xff] }
 0x472   : > { %v1437_v40 = vmul.f32 1.442695, %v1425_v36 }
 0x473   : > { %v1414_v41 = vpop.xlane.xlu1 %1413 }
 0x474   : > { %4512 = vpow2.f32 %v1437_v40  ;;  %v1426_v42 = vsub.f32 %v1385_v13, %v1414_v41  ;;  %v1103_v13 = vld [vmem:[%s5666_s7 + $0x18] sm:$0xff]  ;;  %s5668_s7 = sshll.u32 %s5670_s26, 3 }
 0x475   : > { %v4880_v43 = vpop.eup %4504  ;;  %s732_s0 = scalar_lea.vmem %s5635_s24, %s5668_s7 }
 0x476   : > { %v1439_v45 = vmul.f32 1.442695, %v1426_v42  ;;  %v1445_v46 = vsel %vm982_vm2, %v4880_v43, 0.0 }
 0x477   : > { %1446 = vadd.xlane.f32.xlu1 %v1445_v46  ;;  %v1417_v47 = vpop.xlane.xlu1 %1416 }
 0x478   : > { %4514 = vpow2.f32 %v1439_v45  ;;  %v1427_v48 = vsub.f32 %v4195_v7, %v1417_v47  ;;  %v1091_v7 = vld [vmem:[%s5663_s8 + $0x58] sm:$0xff]  ;;  %v4982_v45 = vpop.f32.mrf.mxu0 }
 0x479   : > { %v4884_v49 = vpop.eup %4506  ;;  %4516 = vpow2.f32 %v1443_v44 }
 0x47a   : > { %v4886_v50 = vpop.eup %4508  ;;  %v1441_v51 = vmul.f32 1.442695, %v1427_v48  ;;  %v1451_v52 = vsel %vm982_vm2, %v4884_v49, 0.0 }
 0x47b   : > { %1452 = vadd.xlane.f32.xlu1 %v1451_v52  ;;  %v1448_v53 = vsel %vm982_vm2, %v4886_v50, 0.0 }
 0x47c   : > { %4518 = vpow2.f32 %v1441_v51  ;;  %1449 = vadd.xlane.f32.xlu0 %v1448_v53  ;;  %v1273_v53 = vpop.f32.mrf.mxu0 }
 0x47d   : > { %v4892_v54 = vpop.eup %4510 }
 0x47e   : > { %v1454_v55 = vsel %vm982_vm2, %v4892_v54, 0.0 }
 0x480   : > { %1455 = vadd.xlane.f32.xlu0 %v1454_v55 }
 0x481   : > { %v4896_v56 = vpop.eup %4512 }
 0x482   : > { %v1457_v57 = vsel %vm982_vm2, %v4896_v56, 0.0 }
 0x483   : > { %1458 = vadd.xlane.f32.xlu1 %v1457_v57 }
 0x485   : > { %v4900_v58 = vpop.eup %4514 }
 0x486   : > { %v1460_v59 = vsel %vm982_vm2, %v4900_v58, 0.0  ;;  %v4904_v60 = vpop.eup %4516 }
 0x487   : > { %1461 = vadd.xlane.f32.xlu0 %v1460_v59  ;;  %v1466_v63 = vsel %vm982_vm2, %v4904_v60, 0.0 }
 0x489   : > { %v4906_v61 = vpop.eup %4518 }
 0x48a   : > { %v1463_v62 = vsel %vm982_vm2, %v4906_v61, 0.0 }
 0x48b   : > { %1464 = vadd.xlane.f32.xlu1 %v1463_v62  ;;  %1467 = vadd.xlane.f32.xlu0 %v1466_v63 }
 0x49c   : > { %1134 = vperm.xlu1 %4439, %v1084_v0  }
 0x4a0   : > { %1144 = vperm.xlu1 %4439, %v1086_v1  }
 0x4a1   : > { %1139 = vperm.xlu0 %4438, %v1085_v2  }
 0x4a4   : > { %1149 = vperm.xlu1 %4439, %v1087_v3  }
 0x4a5   : > { %1154 = vperm.xlu0 %4438, %v1088_v4  }
 0x4a8   : > { %1159 = vperm.xlu1 %4439, %v1089_v5  }
 0x4a9   : > { %1164 = vperm.xlu0 %4438, %v1090_v6  }
 0x4ac   : > { %1169 = vperm.xlu1 %4439, %v1091_v7  }
 0x4ad   : > { %1645 = vperm.xlu0 %4438, %v1106_v8  }
 0x4b0   : > { %1650 = vperm.xlu1 %4439, %v1107_v9  }
 0x4b1   : > { %1635 = vperm.xlu0 %4438, %v1104_v10  }
 0x4b4   : > { %1640 = vperm.xlu1 %4439, %v1105_v11  }
 0x4b5   : > { %1625 = vperm.xlu0 %4438, %v1102_v12  }
 0x4b8   : > { %1630 = vperm.xlu1 %4439, %v1103_v13  }
 0x4b9   : > { %1615 = vperm.xlu0 %4438, %v1100_v14  }
 0x4bc   : > { %1620 = vperm.xlu1 %4439, %v1101_v15  }
 0x4bd   : > { %1812 = vperm.xlu0 %4438, %v1778_v16  }
 0x4c0   : > { %1817 = vperm.xlu1 %4439, %v1779_v17  }
 0x4c1   : > { %1822 = vperm.xlu0 %4438, %v1780_v18  }
 0x4c4   : > { %1827 = vperm.xlu1 %4439, %v1781_v19  }
 0x500   : > { %v1447_v20 = vpop.xlane.xlu1 %1446 }
 0x501   : > { %4520 = vrcp.f32 %v1447_v20 }
 0x504   : > { %v1453_v21 = vpop.xlane.xlu1 %1452 }
 0x505   : > { %v1450_v22 = vpop.xlane.xlu0 %1449 }
 0x506   : > { %4522 = vrcp.f32 %v1450_v22 }
 0x507   : > { %4524 = vrcp.f32 %v1453_v21 }
 0x509   : > { %v1456_v25 = vpop.xlane.xlu0 %1455 }
 0x50a   : > { %4526 = vrcp.f32 %v1456_v25 }
 0x50c   : > { %v1459_v26 = vpop.xlane.xlu1 %1458 }
 0x50d   : > { %4528 = vrcp.f32 %v1459_v26 }
 0x50e   : > { %v4521_v30 = vpop.eup %4520 }
 0x50f   : > { %v4975_v36 = vmul.f32 %v4521_v30, %v4880_v43 }
 0x510   : > { %v1462_v32 = vpop.xlane.xlu0 %1461 }
 0x511   : > { %4530 = vrcp.f32 %v1462_v32  ;;  %v1485_v47 = vsel %vm982_vm2, %v4975_v36, 0.0 }
 0x513   : > { %v4523_v34 = vpop.eup %4522 }
 0x514   : > { %v4525_v38 = vpop.eup %4524  ;;  %v4978_v40 = vmul.f32 %v4523_v34, %v4886_v50  ;;  %v1465_v41 = vpop.xlane.xlu1 %1464 }
 0x515   : > { %v1468_v42 = vpop.xlane.xlu0 %1467  ;;  %4532 = vrcp.f32 %v1465_v41  ;;  %v1479_v43 = vmul.f32 %v4525_v38, %v4884_v49 }
 0x516   : > { %v1486_v44 = vsel %vm982_vm2, %v4978_v40, 0.0  ;;  %4534 = vrcp.f32 %v1468_v42 }
 0x517   : > { %v4527_v46 = vpop.eup %4526  ;;  %v1487_v48 = vadd.f32 %v1486_v44, %v1485_v47  ;;  %v1488_v55 = vsel %vm982_vm2, %v1479_v43, 0.0 }
 0x518   : > { %v1480_v51 = vmul.f32 %v4527_v46, %v4892_v54  ;;  %v1135_v52 = vpop.permute.xlu1 %1134 }
 0x519   : > { %v1489_v62 = vadd.f32 %v1488_v55, %v1487_v48  ;;  %v1271_v0 = vadd.f32 %v1270_v33, %v1135_v52 }
 0x51a   : > { %v4529_v50 = vpop.eup %4528  ;;  %v1490_v63 = vsel %vm982_vm2, %v1480_v51, 0.0 }
 0x51b   : > { %v1481_v57 = vmul.f32 %v4529_v50, %v4896_v56  ;;  %v1491_v54 = vadd.f32 %v1490_v63, %v1489_v62 }
 0x51c   : > { %v1140_v59 = vpop.permute.xlu0 %1139  ;;  %v1145_v22 = vpop.permute.xlu1 %1144 }
 0x51d   : > { %v1274_v1 = vadd.f32 %v1273_v53, %v1140_v59  ;;  %v1492_v4 = vsel %vm982_vm2, %v1481_v57, 0.0 }
 0x51e   : > { %v4531_v2 = vpop.eup %4530  ;;  %v1493_v7 = vadd.f32 %v1492_v4, %v1491_v54 }
 0x51f   : > { %v1482_v3 = vmul.f32 %v4531_v2, %v4900_v58  ;;  %v1516_v49 = vpack.c.bf16 %v1274_v1, %v1271_v0 }
 0x520   : > { %v1150_v42 = vpop.permute.xlu1 %1149 }
 0x521   : > { %4205 = vmatprep.mubr.msk.bf16.mxu0 %vm982_vm2, %v1516_v49  ;;  %v1494_v5 = vsel %vm982_vm2, %v1482_v3, 0.0  ;;  %v1282_v55 = vadd.f32 %v4982_v45, %v1150_v42  ;;  %v4454_v45 = vld [vmem:[%s5667_s28] sm:$0xff]  }
 0x522   : > { %v4533_v6 = vpop.eup %4532  ;;  %v1495_v10 = vadd.f32 %v1494_v5, %v1493_v7  ;;  %4221 = vmatprep.mubr.msk.bf16.mxu1 %vm982_vm2, %v4454_v45 }
 0x523   : > { %v4535_v56 = vpop.eup %4534  ;;  %v1483_v8 = vmul.f32 %v4533_v6, %v4906_v61  ;;  %v4185_v61 = vpop.f32.mrf.mxu0 }
 0x524   : > { %v1484_v9 = vmul.f32 %v4535_v56, %v4904_v60  ;;  %v1160_v52 = vpop.permute.xlu1 %1159 }
 0x525   : > { %v1496_v11 = vsel %vm982_vm2, %v1483_v8, 0.0  ;;  %v1286_v33 = vpop.f32.mrf.mxu0 }
 0x526   : > { %v1497_v12 = vadd.f32 %v1496_v11, %v1495_v10  ;;  %v1498_v58 = vsel %vm982_vm2, %v1484_v9, 0.0 }
 0x527   : > { %v4186_v44 = vpop.f32.mrf.mxu0 }
 0x528   : > { %v1499_v13 = vadd.f32 %v1498_v58, %v1497_v12 }
 0x529   : > { %v1289_v50 = vpop.f32.mrf.mxu0 }
 0x52a   : > { %v1500_v14 = vrot.slane %v1499_v13, 4 }
 0x52c   : > { %v1501_v15 = vadd.f32 %v1500_v14, %v1499_v13 }
 0x52e   : > { %v1502_v16 = vrot.slane %v1501_v15, 2 }
 0x530   : > { %v1503_v17 = vadd.f32 %v1502_v16, %v1501_v15 }
 0x532   : > { %v1504_v18 = vrot.slane %v1503_v17, 1 }
 0x534   : > { %v1505_v19 = vadd.f32 %v1504_v18, %v1503_v17  ;;  %v4455_v18 = vld [vmem:[%s5667_s28 + $0x8] sm:$0xff]  }
 0x536   : > { %v1506_v20 = vadd.f32 1e-09, %v1505_v19  ;;  %v4456_v19 = vld [vmem:[%s5667_s28 + $0x10] sm:$0xff]  }
 0x538   : > { %4536 = vrcp.f32 %v1506_v20  ;;  %v4457_v20 = vld [vmem:[%s5667_s28 + $0x18] sm:$0xff]  }
 0x545   : > { %v4537_v21 = vpop.eup %4536 }
 0x546   : > { %v1514_v25 = vmul.f32 %v4537_v21, %v1483_v8  ;;  %v1515_v60 = vmul.f32 %v4537_v21, %v1484_v9  ;;  %v1512_v26 = vmul.f32 %v4537_v21, %v1481_v57  ;;  %v1513_v30 = vmul.f32 %v4537_v21, %v1482_v3  ;;  %v1155_v57 = vpop.permute.xlu0 %1154 }
 0x547   : > { %v1510_v38 = vmul.f32 %v4537_v21, %v1479_v43  ;;  %v1511_v41 = vmul.f32 %v4537_v21, %v1480_v51  ;;  %v1508_v47 = vmul.f32 %v4537_v21, %v4975_v36  ;;  %v1509_v48 = vmul.f32 %v4537_v21, %v4978_v40  ;;  %v1170_v36 = vpop.permute.xlu1 %1169  ;;  %v4458_v21 = vld [vmem:[%s5620_s9] sm:$0xff]  }
 0x548   : > { %v1523_v32 = vpack.c.bf16 %v1515_v60, %v1514_v25  ;;  %v1522_v34 = vpack.c.bf16 %v1513_v30, %v1512_v26  ;;  %v1290_v43 = vadd.f32 %v1289_v50, %v1160_v52  ;;  %v1279_v51 = vadd.f32 %v4972_v29, %v1145_v22 }
 0x549   : > { %v1521_v46 = vpack.c.bf16 %v1511_v41, %v1510_v38  ;;  %v1520_v53 = vpack.c.bf16 %v1509_v48, %v1508_v47  ;;  %v1287_v59 = vadd.f32 %v1286_v33, %v1155_v57  ;;  %v1298_v0 = vadd.f32 %v4186_v44, %v1170_v36 }
 0x54a   : > { %4197 = vmatprep.subr.bf16.mxu0 %v1523_v32  ;;  %v1517_v62 = vpack.c.bf16 %v1282_v55, %v1279_v51  ;;  %v1165_v40 = vpop.permute.xlu0 %1164 }
 0x54b   : > { %4198 = vmatpush3.bf16.msra.mxu0 %v1523_v32  ;;  %v1518_v63 = vpack.c.bf16 %v1290_v43, %v1287_v59  ;;  %v1295_v1 = vadd.f32 %v4185_v61, %v1165_v40  ;;  %v1651_v22 = vpop.permute.xlu1 %1650 }
 0x54c   : > { %4199 = vmatprep.subr.bf16.mxu0 %v1522_v34 }
 0x54d   : > { %v1519_v2 = vpack.c.bf16 %v1298_v0, %v1295_v1 }
 0x54e   : > { %v1646_v61 = vpop.permute.xlu0 %1645 }
 0x54f   : > { %4200 = vmatpush3.bf16.msra.mxu0 %v1522_v34  ;;  %v1641_v26 = vpop.permute.xlu1 %1640 }
 0x550   : > { %4201 = vmatprep.subr.bf16.mxu0 %v1521_v46 }
 0x552   : > { %v1636_v32 = vpop.permute.xlu0 %1635 }
 0x553   : > { %4202 = vmatpush3.bf16.msra.mxu0 %v1521_v46  ;;  %v1631_v41 = vpop.permute.xlu1 %1630 }
 0x554   : > { %4203 = vmatprep.subr.bf16.mxu0 %v1520_v53 }
 0x556   : > { %v1626_v46 = vpop.permute.xlu0 %1625 }
 0x557   : > { %4204 = vmatpush3.bf16.msra.mxu0 %v1520_v53  ;;  %v1621_v59 = vpop.permute.xlu1 %1620 }
 0x55a   : > { %4206 = vmatmul.mubr.msk.bf16.vlgmr.msra.gmra.mxu0 %vm982_vm2, %v1517_v62  ;;  %v1616_v1 = vpop.permute.xlu0 %1615 }
 0x55b   : > { %4209 = vmatprep.mubr.msk.bf16.mxu0 %vm982_vm2, %v1518_v63 }
 0x562   : > { %4210 = vmatmul.mubr.msk.bf16.gmra.mxu0 %vm982_vm2, %v1519_v2 }
 0x563   : > { %4237 = vmatprep.mubr.msk.bf16.mxu0 %vm982_vm2, %v4458_v21  ;;  %v4460_v21 = vld [vmem:[%s5620_s9 + $0x10] sm:$0xff]  }
 0x61a   : > { %v4207_v29 = vpop.f32.mrf.mxu0 }
 0x61b   : > { %v1603_v13 = vsub.f32 %v4838_v35, %v4207_v29 }
 0x61c   : > { %v1570_v3 = vpop.f32.mrf.mxu0 }
 0x61d   : > { %v1601_v16 = vsub.f32 %v4844_v39, %v1570_v3 }
 0x61e   : > { %v4208_v49 = vpop.f32.mrf.mxu0 }
 0x61f   : > { %v1604_v12 = vsub.f32 %v4834_v31, %v4208_v49 }
 0x620   : > { %v1573_v4 = vpop.f32.mrf.mxu0 }
 0x621   : > { %v1610_v14 = vpack.c.bf16 %v1604_v12, %v1603_v13  ;;  %v1602_v15 = vsub.f32 %v4840_v37, %v1573_v4 }
 0x622   : > { %v4211_v54 = vpop.f32.mrf.mxu0 }
 0x623   : > { %v1607_v7 = vsub.f32 %v4824_v23, %v4211_v54  ;;  %v1609_v17 = vpack.c.bf16 %v1602_v15, %v1601_v16 }
 0x624   : > { %v1586_v5 = vpop.f32.mrf.mxu0 }
 0x625   : > { %v1605_v9 = vsub.f32 %v4828_v27, %v1586_v5 }
 0x626   : > { %v4212_v6 = vpop.f32.mrf.mxu0 }
 0x627   : > { %v1608_v56 = vsub.f32 %v4826_v24, %v4212_v6  ;;  %v1818_v6 = vpop.permute.xlu1 %1817 }
 0x628   : > { %v1589_v8 = vpop.f32.mrf.mxu0 }
 0x629   : > { %v1612_v10 = vpack.c.bf16 %v1608_v56, %v1607_v7  ;;  %v1606_v11 = vsub.f32 %v4830_v28, %v1589_v8 }
 0x62b   : > { %v1611_v58 = vpack.c.bf16 %v1606_v11, %v1605_v9  ;;  %4213 = vmatprep.subr.bf16.mxu1 %v1612_v10  ;;  %v1828_v9 = vpop.permute.xlu1 %1827 }
 0x62c   : > { %4214 = vmatpush3.bf16.msra.mxu1 %v1612_v10 }
 0x62d   : > { %4215 = vmatprep.subr.bf16.mxu1 %v1611_v58 }
 0x630   : > { %4216 = vmatpush3.bf16.msra.mxu1 %v1611_v58 }
 0x631   : > { %4217 = vmatprep.subr.bf16.mxu1 %v1610_v14 }
 0x634   : > { %4218 = vmatpush3.bf16.msra.mxu1 %v1610_v14 }
 0x635   : > { %4219 = vmatprep.subr.bf16.mxu1 %v1609_v17 }
 0x638   : > { %4220 = vmatpush3.bf16.msra.mxu1 %v1609_v17 }
 0x63b   : > { %4222 = vmatmul.mubr.msk.bf16.vlgmr.msra.gmra.mxu1 %vm982_vm2, %v4455_v18 }
 0x63c   : > { %4225 = vmatprep.mubr.msk.bf16.mxu1 %vm982_vm2, %v4456_v19 }
 0x643   : > { %4226 = vmatmul.mubr.msk.bf16.gmra.mxu1 %vm982_vm2, %v4457_v20 }
 0x6fb   : > { %v4223_v25 = vpop.f32.mrf.mxu1 }
 0x6fc   : > { %v1728_v53 = vadd.f32 %v4223_v25, %v1626_v46  ;;  %v4463_v25 = vld [vmem:[%s5620_s9 + $0x28] sm:$0xff]  }
 0x6fd   : > { %v1719_v60 = vpop.f32.mrf.mxu1 }
 0x6fe   : > { %v1752_v2 = vmax.f32 %v1728_v53, 0.0  ;;  %v1720_v45 = vadd.f32 %v1719_v60, %v1616_v1 }
 0x6ff   : > { %v4224_v30 = vpop.f32.mrf.mxu1 }
 0x700   : > { %v1731_v47 = vadd.f32 %v4224_v30, %v1631_v41 }
 0x701   : > { %v1722_v33 = vpop.f32.mrf.mxu1 }
 0x702   : > { %v1753_v62 = vmax.f32 %v1731_v47, 0.0  ;;  %v1723_v63 = vadd.f32 %v1722_v33, %v1621_v59 }
 0x703   : > { %v4227_v34 = vpop.f32.mrf.mxu1 }
 0x704   : > { %v1744_v38 = vadd.f32 %v4227_v34, %v1646_v61  ;;  %v1751_v4 = vmax.f32 %v1723_v63, 0.0  ;;  %v4462_v61 = vld [vmem:[%s5620_s9 + $0x20] sm:$0xff]  }
 0x705   : > { %v1735_v42 = vpop.f32.mrf.mxu1 }
 0x706   : > { %v1736_v44 = vadd.f32 %v1735_v42, %v1636_v32  ;;  %v1756_v50 = vmax.f32 %v1744_v38, 0.0  ;;  %v5064_v54 = vadd.f32 %v1751_v4, %v4840_v37  ;;  %v4459_v37 = vld [vmem:[%s5620_s9 + $0x8] sm:$0xff]  }
 0x707   : > { %v4228_v48 = vpop.f32.mrf.mxu1 }
 0x708   : > { %v1747_v52 = vadd.f32 %v4228_v48, %v1651_v22  ;;  %v1754_v57 = vmax.f32 %v1736_v44, 0.0  ;;  %v5035_v36 = vadd.f32 %v1756_v50, %v4824_v23  ;;  %v5051_v23 = vadd.f32 %v1753_v62, %v4834_v31  ;;  %v4461_v22 = vld [vmem:[%s5620_s9 + $0x18] sm:$0xff]  }
 0x709   : > { %v1738_v55 = vpop.f32.mrf.mxu1 }
 0x70a   : > { %v1757_v43 = vmax.f32 %v1747_v52, 0.0  ;;  %v1739_v51 = vadd.f32 %v1738_v55, %v1641_v26  ;;  %v5041_v29 = vadd.f32 %v1754_v57, %v4828_v27  ;;  %v5060_v27 = vadd.f32 %v1752_v2, %v4838_v35 }
 0x70c   : > { %v5038_v40 = vadd.f32 %v1757_v43, %v4826_v24  ;;  %v1755_v0 = vmax.f32 %v1739_v51, 0.0  ;;  %v5068_v31 = vpack.c.bf16 %v5051_v23, %v5060_v27 }
 0x70e   : > { %v5044_v3 = vadd.f32 %v1755_v0, %v4830_v28  ;;  %v5048_v49 = vpack.c.bf16 %v5038_v40, %v5035_v36  ;;  %v1750_v28 = vmax.f32 %v1720_v45, 0.0 }
 0x710   : > { %4229 = vmatprep.subr.bf16.mxu0 %v5048_v49  ;;  %v5056_v24 = vpack.c.bf16 %v5044_v3, %v5041_v29  ;;  %v5072_v5 = vadd.f32 %v1750_v28, %v4844_v39  ;;  %v1813_v39 = vpop.permute.xlu0 %1812 }
 0x711   : > { %4230 = vmatpush3.bf16.msra.mxu0 %v5048_v49 }
 0x712   : > { %4231 = vmatprep.subr.bf16.mxu0 %v5056_v24  ;;  %v5077_v35 = vpack.c.bf16 %v5064_v54, %v5072_v5 }
 0x714   : > { %v1823_v8 = vpop.permute.xlu0 %1822 }
 0x715   : > { %4232 = vmatpush3.bf16.msra.mxu0 %v5056_v24 }
 0x716   : > { %4233 = vmatprep.subr.bf16.mxu0 %v5068_v31 }
 0x719   : > { %4234 = vmatpush3.bf16.msra.mxu0 %v5068_v31 }
 0x71a   : > { %4235 = vmatprep.subr.bf16.mxu0 %v5077_v35 }
 0x71d   : > { %4236 = vmatpush3.bf16.msra.mxu0 %v5077_v35 }
 0x720   : > { %4238 = vmatmul.mubr.msk.bf16.vlgmr.msra.gmra.mxu0 %vm982_vm2, %v4459_v37 }
 0x721   : > { %4241 = vmatprep.mubr.msk.bf16.mxu0 %vm982_vm2, %v4460_v21 }
 0x728   : > { %4242 = vmatmul.mubr.msk.bf16.gmra.mxu0 %vm982_vm2, %v4461_v22 }
 0x729   : > { %4245 = vmatprep.mubr.msk.bf16.mxu0 %vm982_vm2, %v4462_v61 }
 0x730   : > { %4246 = vmatmul.mubr.msk.bf16.gmra.mxu0 %vm982_vm2, %v4463_v25 }
 0x7e0   : > { %v4239_v7 = vpop.f32.mrf.mxu0 }
 0x7e1   : > { %v1961_v11 = vadd.f32 %v4239_v7, %v1823_v8 }
 0x7e2   : > { %v1952_v56 = vpop.f32.mrf.mxu0 }
 0x7e3   : > { %v1953_v13 = vadd.f32 %v1952_v56, %v1813_v39 }
 0x7e4   : > { %v4240_v10 = vpop.f32.mrf.mxu0 }
 0x7e5   : > { %v1964_v12 = vadd.f32 %v4240_v10, %v1828_v9 }
 0x7e6   : > { %v1955_v58 = vpop.f32.mrf.mxu0 }
 0x7e7   : > { %v2000_v14 = vpack.c.bf16 %v1964_v12, %v1961_v11  ;;  %v1956_v15 = vadd.f32 %v1955_v58, %v1818_v6 }
 0x7e9   : > { %v1999_v16 = vpack.c.bf16 %v1956_v15, %v1953_v13  ;;  %4249 = vmatprep.subr.bf16.mxu1 %v2000_v14 }
 0x7ea   : > { %4250 = vmatpush3.bf16.msra.mxu1 %v2000_v14 }
 0x7eb   : > { %2001 = vxpose.xlu0.c.b16.start.end [1/1] (short) (narrow) %v1999_v16, 64 }
 0x84d   : > { %v2009_v17 = vpop.trf.xlu0 }
 0x84e   : > { %4251 = vmatprep.mubr.msk.bf16.mxu1 %vm1319_vm3, %v2009_v17 }
 0x851   : > { %v2010_v18 = vpop.trf.xlu0 }
 0x852   : > { %4252 = vmatmul.mubr.msk.bf16.vlgmr.msra.gmra.mxu1 %vm1319_vm3, %v2010_v18 }
 0x855   : > { %v2011_v19 = vpop.trf.xlu0 }
 0x856   : > { %4255 = vmatprep.mubr.msk.bf16.mxu1 %vm1319_vm3, %v2011_v19 }
 0x859   : > { %v2012_v20 = vpop.trf.xlu0 }
 0x85a   : > { %4256 = vmatmul.mubr.msk.bf16.gmra.mxu1 %vm1319_vm3, %v2012_v20 }
 0x912   : > { %v4253_v60 = vpop.f32.mrf.mxu1 }
 0x913   : > { %v2100_v34 = vsel %vm982_vm2, %v4253_v60, -inf }
 0x914   : > { %v2063_v26 = vpop.f32.mrf.mxu1 }
 0x915   : > { %v2094_v30 = vsel %vm982_vm2, %v2063_v26, -inf }
 0x916   : > { %2095 = vmax.xlane.f32.xlu1 %v2094_v30  ;;  %v4254_v32 = vpop.f32.mrf.mxu1 }
 0x917   : > { %v2103_v44 = vsel %vm982_vm2, %v4254_v32, -inf }
 0x918   : > { %v2066_v33 = vpop.f32.mrf.mxu1 }
 0x919   : > { %v2097_v38 = vsel %vm982_vm2, %v2066_v33, -inf }
 0x91a   : > { %2101 = vmax.xlane.f32.xlu1 %v2100_v34  ;;  %2098 = vmax.xlane.f32.xlu0 %v2097_v38  ;;  %v4257_v41 = vpop.f32.mrf.mxu1  ;;  %v1784_v34 = vld [vmem:[%s5621_s10 + $0x30] sm:$0xff]  ;;  %v1783_v38 = vld [vmem:[%s5621_s10 + $0x28] sm:$0xff] }
 0x91b   : > { %v2112_v53 = vsel %vm982_vm2, %v4257_v41, -inf }
 0x91c   : > { %v2079_v42 = vpop.f32.mrf.mxu1 }
 0x91d   : > { %v2106_v48 = vsel %vm982_vm2, %v2079_v42, -inf }
 0x91e   : > { %2104 = vmax.xlane.f32.xlu1 %v2103_v44  ;;  %v4258_v46 = vpop.f32.mrf.mxu1  ;;  %v1787_v44 = vld [vmem:[%s5621_s10 + $0x48] sm:$0xff] }
 0x91f   : > { %v2115_v47 = vsel %vm982_vm2, %v4258_v46, -inf }
 0x920   : > { %2116 = vmax.xlane.f32.xlu0 %v2115_v47  ;;  %v2082_v50 = vpop.f32.mrf.mxu1  ;;  %v1789_v47 = vld [vmem:[%s5621_s10 + $0x58] sm:$0xff] }
 0x921   : > { %v2109_v52 = vsel %vm982_vm2, %v2082_v50, -inf }
 0x922   : > { %2107 = vmax.xlane.f32.xlu1 %v2106_v48  ;;  %v1804_v48 = vld [vmem:[%s5623_s12 + $0x30] sm:$0xff] }
 0x926   : > { %2110 = vmax.xlane.f32.xlu1 %v2109_v52  ;;  %v1802_v52 = vld [vmem:[%s5623_s12 + $0x20] sm:$0xff] }
 0x92a   : > { %2113 = vmax.xlane.f32.xlu1 %v2112_v53  ;;  %v1803_v53 = vld [vmem:[%s5623_s12 + $0x28] sm:$0xff] }
 0x99f   : > { %v2096_v55 = vpop.xlane.xlu1 %2095 }
 0x9a0   : > { %v2118_v57 = vsub.f32 %v2063_v26, %v2096_v55  ;;  %v1800_v55 = vld [vmem:[%s5623_s12 + $0x10] sm:$0xff] }
 0x9a2   : > { %v2126_v43 = vmul.f32 1.442695, %v2118_v57  ;;  %v1801_v57 = vld [vmem:[%s5623_s12 + $0x18] sm:$0xff] }
 0x9a3   : > { %v2102_v51 = vpop.xlane.xlu1 %2101  ;;  %v2099_v59 = vpop.xlane.xlu0 %2098 }
 0x9a4   : > { %4538 = vpow2.f32 %v2126_v43  ;;  %v2120_v62 = vsub.f32 %v4253_v60, %v2102_v51  ;;  %v2119_v63 = vsub.f32 %v2066_v33, %v2099_v59  ;;  %v1782_v33 = vld [vmem:[%s5621_s10 + $0x20] sm:$0xff]  ;;  %v1799_v51 = vld [vmem:[%s5623_s12 + $0x8] sm:$0xff]  ;;  %v2835_v59 = vld [vmem:[%s5626_s15 + $0x70] sm:$0xff] }
 0x9a5   : > { %v1798_v43 = vld [vmem:[%s5623_s12] sm:$0xff] }
 0x9a6   : > { %v2130_v0 = vmul.f32 1.442695, %v2120_v62  ;;  %v2128_v1 = vmul.f32 1.442695, %v2119_v63  ;;  %v2836_v62 = vld [vmem:[%s5626_s15 + $0x78] sm:$0xff]  ;;  %v2833_v63 = vld [vmem:[%s5626_s15 + $0x60] sm:$0xff] }
 0x9a7   : > { %v2105_v2 = vpop.xlane.xlu1 %2104 }
 0x9a8   : > { %4540 = vpow2.f32 %v2130_v0  ;;  %v2121_v45 = vsub.f32 %v4254_v32, %v2105_v2  ;;  %v2834_v0 = vld [vmem:[%s5626_s15 + $0x68] sm:$0xff]  ;;  %v2832_v2 = vld [vmem:[%s5626_s15 + $0x58] sm:$0xff] }
 0x9a9   : > { %4542 = vpow2.f32 %v2128_v1  ;;  %v2117_v28 = vpop.xlane.xlu0 %2116  ;;  %v2831_v1 = vld [vmem:[%s5626_s15 + $0x50] sm:$0xff] }
 0x9aa   : > { %v2132_v4 = vmul.f32 1.442695, %v2121_v45  ;;  %v2125_v6 = vsub.f32 %v4258_v46, %v2117_v28  ;;  %v1788_v46 = vld [vmem:[%s5621_s10 + $0x50] sm:$0xff]  ;;  %v2829_v45 = vld [vmem:[%s5626_s15 + $0x40] sm:$0xff] }
 0x9ab   : > { %v2108_v37 = vpop.xlane.xlu1 %2107  ;;  %v2827_v28 = vld [vmem:[%s5626_s15 + $0x30] sm:$0xff] }
 0x9ac   : > { %4544 = vpow2.f32 %v2132_v4  ;;  %v2122_v39 = vsub.f32 %v2079_v42, %v2108_v37  ;;  %v2140_v10 = vmul.f32 1.442695, %v2125_v6  ;;  %v1786_v42 = vld [vmem:[%s5621_s10 + $0x40] sm:$0xff]  ;;  %v2830_v4 = vld [vmem:[%s5626_s15 + $0x48] sm:$0xff]  ;;  %v2828_v37 = vld [vmem:[%s5626_s15 + $0x38] sm:$0xff] }
 0x9ad   : > { %v2826_v6 = vld [vmem:[%s5626_s15 + $0x28] sm:$0xff] }
 0x9ae   : > { %v2134_v7 = vmul.f32 1.442695, %v2122_v39  ;;  %v2825_v39 = vld [vmem:[%s5626_s15 + $0x20] sm:$0xff] }
 0x9af   : > { %v2111_v56 = vpop.xlane.xlu1 %2110 }
 0x9b0   : > { %4546 = vpow2.f32 %v2134_v7  ;;  %v2123_v8 = vsub.f32 %v2082_v50, %v2111_v56  ;;  %v1805_v50 = vld [vmem:[%s5623_s12 + $0x38] sm:$0xff]  ;;  %v2823_v7 = vld [vmem:[%s5626_s15 + $0x10] sm:$0xff] }
 0x9b1   : > { %v5114_v9 = vpop.eup %4538  ;;  %v2824_v56 = vld [vmem:[%s5626_s15 + $0x18] sm:$0xff] }
 0x9b2   : > { %v2136_v11 = vmul.f32 1.442695, %v2123_v8  ;;  %v2142_v12 = vsel %vm982_vm2, %v5114_v9, 0.0  ;;  %v2821_v8 = vld [vmem:[%s5626_s15] sm:$0xff] }
 0x9b3   : > { %2143 = vadd.xlane.f32.xlu1 %v2142_v12  ;;  %v2114_v58 = vpop.xlane.xlu1 %2113 }
 0x9b4   : > { %4548 = vpow2.f32 %v2136_v11  ;;  %v2124_v13 = vsub.f32 %v4257_v41, %v2114_v58  ;;  %v1785_v41 = vld [vmem:[%s5621_s10 + $0x38] sm:$0xff] }
 0x9b5   : > { %v5118_v14 = vpop.eup %4540  ;;  %4550 = vpow2.f32 %v2140_v10  ;;  %v2822_v10 = vld [vmem:[%s5626_s15 + $0x8] sm:$0xff] }
 0x9b6   : > { %v5120_v15 = vpop.eup %4542  ;;  %v2138_v16 = vmul.f32 1.442695, %v2124_v13  ;;  %v2148_v17 = vsel %vm982_vm2, %v5118_v14, 0.0 }
 0x9b7   : > { %2149 = vadd.xlane.f32.xlu1 %v2148_v17  ;;  %v2145_v18 = vsel %vm982_vm2, %v5120_v15, 0.0  ;;  %v5242_v17 = vpop.f32.mrf.mxu0 }
 0x9b8   : > { %4552 = vpow2.f32 %v2138_v16  ;;  %2146 = vadd.xlane.f32.xlu0 %v2145_v18 }
 0x9b9   : > { %v5126_v19 = vpop.eup %4544 }
 0x9ba   : > { %v2151_v20 = vsel %vm982_vm2, %v5126_v19, 0.0 }
 0x9bc   : > { %2152 = vadd.xlane.f32.xlu0 %v2151_v20 }
 0x9bd   : > { %v5130_v21 = vpop.eup %4546 }
 0x9be   : > { %v2154_v22 = vsel %vm982_vm2, %v5130_v21, 0.0 }
 0x9bf   : > { %2155 = vadd.xlane.f32.xlu1 %v2154_v22  ;;  %v1968_v22 = vpop.f32.mrf.mxu0 }
 0x9c1   : > { %v5134_v61 = vpop.eup %4548 }
 0x9c2   : > { %v2157_v25 = vsel %vm982_vm2, %v5134_v61, 0.0  ;;  %v5138_v60 = vpop.eup %4550 }
 0x9c3   : > { %2158 = vadd.xlane.f32.xlu0 %v2157_v25  ;;  %v2163_v32 = vsel %vm982_vm2, %v5138_v60, 0.0 }
 0x9c5   : > { %v5140_v26 = vpop.eup %4552 }
 0x9c6   : > { %v2160_v30 = vsel %vm982_vm2, %v5140_v26, 0.0 }
 0x9c7   : > { %2161 = vadd.xlane.f32.xlu1 %v2160_v30  ;;  %2164 = vadd.xlane.f32.xlu0 %v2163_v32 }
 0x9d8   : > { %1832 = vperm.xlu1 %4439, %v1782_v33  }
 0x9dc   : > { %1842 = vperm.xlu1 %4439, %v1784_v34  }
 0x9dd   : > { %1837 = vperm.xlu0 %4438, %v1783_v38  }
 0x9e0   : > { %1847 = vperm.xlu1 %4439, %v1785_v41  }
 0x9e1   : > { %1852 = vperm.xlu0 %4438, %v1786_v42   ;;  %v5252_v42 = vpop.f32.mrf.mxu0 }
 0x9e4   : > { %1857 = vperm.xlu1 %4439, %v1787_v44  }
 0x9e5   : > { %1862 = vperm.xlu0 %4438, %v1788_v46  }
 0x9e8   : > { %1867 = vperm.xlu1 %4439, %v1789_v47  }
 0x9e9   : > { %2342 = vperm.xlu0 %4438, %v1804_v48  }
 0x9ec   : > { %2347 = vperm.xlu1 %4439, %v1805_v50  }
 0x9ed   : > { %2332 = vperm.xlu0 %4438, %v1802_v52   ;;  %v1971_v52 = vpop.f32.mrf.mxu0 }
 0x9f0   : > { %2337 = vperm.xlu1 %4439, %v1803_v53  }
 0x9f1   : > { %2322 = vperm.xlu0 %4438, %v1800_v55  }
 0x9f4   : > { %2327 = vperm.xlu1 %4439, %v1801_v57  }
 0x9f5   : > { %2312 = vperm.xlu0 %4438, %v1798_v43  }
 0x9f8   : > { %2317 = vperm.xlu1 %4439, %v1799_v51  }
 0x9f9   : > { %2909 = vperm.xlu0 %4438, %v2835_v59  }
 0x9fc   : > { %2914 = vperm.xlu1 %4439, %v2836_v62  }
 0x9fd   : > { %2899 = vperm.xlu0 %4438, %v2833_v63  }
 0xa00   : > { %2904 = vperm.xlu1 %4439, %v2834_v0  }
 0xa01   : > { %2889 = vperm.xlu0 %4438, %v2831_v1  }
 0xa04   : > { %2894 = vperm.xlu1 %4439, %v2832_v2  }
 0xa05   : > { %2879 = vperm.xlu0 %4438, %v2829_v45  }
 0xa08   : > { %2884 = vperm.xlu1 %4439, %v2830_v4  }
 0xa09   : > { %2869 = vperm.xlu0 %4438, %v2827_v28  }
 0xa0c   : > { %2874 = vperm.xlu1 %4439, %v2828_v37  }
 0xa0d   : > { %2859 = vperm.xlu0 %4438, %v2825_v39  }
 0xa10   : > { %2864 = vperm.xlu1 %4439, %v2826_v6  }
 0xa11   : > { %2849 = vperm.xlu0 %4438, %v2823_v7  }
 0xa14   : > { %2854 = vperm.xlu1 %4439, %v2824_v56  }
 0xa15   : > { %2839 = vperm.xlu0 %4438, %v2821_v8  }
 0xa18   : > { %2844 = vperm.xlu1 %4439, %v2822_v10  }
 0xa3c   : > { %v2144_v11 = vpop.xlane.xlu1 %2143 }
 0xa3d   : > { %4554 = vrcp.f32 %v2144_v11 }
 0xa40   : > { %v2150_v12 = vpop.xlane.xlu1 %2149 }
 0xa41   : > { %v2147_v58 = vpop.xlane.xlu0 %2146 }
 0xa42   : > { %4556 = vrcp.f32 %v2147_v58 }
 0xa43   : > { %4558 = vrcp.f32 %v2150_v12 }
 0xa45   : > { %v2153_v13 = vpop.xlane.xlu0 %2152 }
 0xa46   : > { %4560 = vrcp.f32 %v2153_v13 }
 0xa48   : > { %v2156_v16 = vpop.xlane.xlu1 %2155 }
 0xa49   : > { %4562 = vrcp.f32 %v2156_v16 }
 0xa4a   : > { %v4555_v18 = vpop.eup %4554 }
 0xa4b   : > { %v5245_v30 = vmul.f32 %v4555_v18, %v5114_v9 }
 0xa4c   : > { %v2159_v20 = vpop.xlane.xlu0 %2158 }
 0xa4d   : > { %4564 = vrcp.f32 %v2159_v20  ;;  %v2182_v46 = vsel %vm982_vm2, %v5245_v30, 0.0 }
 0xa4f   : > { %v4557_v25 = vpop.eup %4556 }
 0xa50   : > { %v4559_v32 = vpop.eup %4558  ;;  %v5248_v33 = vmul.f32 %v4557_v25, %v5120_v15  ;;  %v2162_v34 = vpop.xlane.xlu1 %2161 }
 0xa51   : > { %v2165_v38 = vpop.xlane.xlu0 %2164  ;;  %4566 = vrcp.f32 %v2162_v34  ;;  %v2176_v9 = vmul.f32 %v4559_v32, %v5118_v14 }
 0xa52   : > { %v2183_v41 = vsel %vm982_vm2, %v5248_v33, 0.0  ;;  %4568 = vrcp.f32 %v2165_v38 }
 0xa53   : > { %v4561_v44 = vpop.eup %4560  ;;  %v2184_v47 = vadd.f32 %v2183_v41, %v2182_v46  ;;  %v2185_v53 = vsel %vm982_vm2, %v2176_v9, 0.0 }
 0xa54   : > { %v2177_v48 = vmul.f32 %v4561_v44, %v5126_v19  ;;  %v1833_v50 = vpop.permute.xlu1 %1832 }
 0xa55   : > { %v2186_v43 = vadd.f32 %v2185_v53, %v2184_v47  ;;  %v1969_v59 = vadd.f32 %v1968_v22, %v1833_v50 }
 0xa56   : > { %v4563_v15 = vpop.eup %4562  ;;  %v2187_v51 = vsel %vm982_vm2, %v2177_v48, 0.0 }
 0xa57   : > { %v2178_v55 = vmul.f32 %v4563_v15, %v5130_v21  ;;  %v2188_v19 = vadd.f32 %v2187_v51, %v2186_v43 }
 0xa58   : > { %v1838_v57 = vpop.permute.xlu0 %1837  ;;  %v1843_v20 = vpop.permute.xlu1 %1842 }
 0xa59   : > { %v1972_v62 = vadd.f32 %v1971_v52, %v1838_v57  ;;  %v2189_v1 = vsel %vm982_vm2, %v2178_v55, 0.0 }
 0xa5a   : > { %v4565_v63 = vpop.eup %4564  ;;  %v2190_v4 = vadd.f32 %v2189_v1, %v2188_v19 }
 0xa5b   : > { %v2179_v0 = vmul.f32 %v4565_v63, %v5134_v61  ;;  %v2213_v14 = vpack.c.bf16 %v1972_v62, %v1969_v59 }
 0xa5c   : > { %v1848_v47 = vpop.permute.xlu1 %1847  ;;  %v1853_v59 = vpop.permute.xlu0 %1852 }
 0xa5d   : > { %4267 = vmatprep.mubr.msk.bf16.mxu1 %vm982_vm2, %v2213_v14  ;;  %v2191_v2 = vsel %vm982_vm2, %v2179_v0, 0.0  ;;  %v1980_v51 = vadd.f32 %v5252_v42, %v1848_v47  ;;  %v4464_v42 = vld [vmem:[%s5622_s11] sm:$0xff]  }
 0xa5e   : > { %v4567_v45 = vpop.eup %4566  ;;  %v2192_v39 = vadd.f32 %v2191_v2, %v2190_v4  ;;  %4283 = vmatprep.mubr.msk.bf16.mxu0 %vm982_vm2, %v4464_v42 }
 0xa5f   : > { %v4569_v21 = vpop.eup %4568  ;;  %v2180_v28 = vmul.f32 %v4567_v45, %v5140_v26  ;;  %v4247_v26 = vpop.f32.mrf.mxu0 }
 0xa60   : > { %v2181_v37 = vmul.f32 %v4569_v21, %v5138_v60 }
 0xa61   : > { %v2193_v6 = vsel %vm982_vm2, %v2180_v28, 0.0  ;;  %v1984_v38 = vpop.f32.mrf.mxu0 }
 0xa62   : > { %v2194_v7 = vadd.f32 %v2193_v6, %v2192_v39  ;;  %v2195_v61 = vsel %vm982_vm2, %v2181_v37, 0.0  ;;  %v1985_v62 = vadd.f32 %v1984_v38, %v1853_v59  ;;  %v4481_v38 = vld [vmem:[%s5624_s13 + $0x38] sm:$0xff]  }
 0xa63   : > { %v4248_v15 = vpop.f32.mrf.mxu0 }
 0xa64   : > { %v2196_v56 = vadd.f32 %v2195_v61, %v2194_v7 }
 0xa65   : > { %v1987_v57 = vpop.f32.mrf.mxu0 }
 0xa66   : > { %v2197_v8 = vrot.slane %v2196_v56, 4 }
 0xa68   : > { %v2198_v10 = vadd.f32 %v2197_v8, %v2196_v56 }
 0xa6a   : > { %v2199_v11 = vrot.slane %v2198_v10, 2 }
 0xa6c   : > { %v2200_v12 = vadd.f32 %v2199_v11, %v2198_v10 }
 0xa6e   : > { %v2201_v58 = vrot.slane %v2200_v12, 1 }
 0xa70   : > { %v2202_v13 = vadd.f32 %v2201_v58, %v2200_v12 }
 0xa72   : > { %v2203_v16 = vadd.f32 1e-09, %v2202_v13 }
 0xa74   : > { %4570 = vrcp.f32 %v2203_v16 }
 0xa81   : > { %v4571_v18 = vpop.eup %4570 }
 0xa82   : > { %v2211_v22 = vmul.f32 %v4571_v18, %v2180_v28  ;;  %v2212_v60 = vmul.f32 %v4571_v18, %v2181_v37  ;;  %v2209_v25 = vmul.f32 %v4571_v18, %v2178_v55  ;;  %v2210_v32 = vmul.f32 %v4571_v18, %v2179_v0  ;;  %v1858_v55 = vpop.permute.xlu1 %1857 }
 0xa83   : > { %v2207_v44 = vmul.f32 %v4571_v18, %v2176_v9  ;;  %v2208_v46 = vmul.f32 %v4571_v18, %v2177_v48  ;;  %v2205_v52 = vmul.f32 %v4571_v18, %v5245_v30  ;;  %v2206_v53 = vmul.f32 %v4571_v18, %v5248_v33  ;;  %v1863_v33 = vpop.permute.xlu0 %1862 }
 0xa84   : > { %v2220_v34 = vpack.c.bf16 %v2212_v60, %v2211_v22  ;;  %v2219_v41 = vpack.c.bf16 %v2210_v32, %v2209_v25  ;;  %v1988_v9 = vadd.f32 %v1987_v57, %v1858_v55  ;;  %v1977_v48 = vadd.f32 %v5242_v17, %v1843_v20  ;;  %v4465_v20 = vld [vmem:[%s5622_s11 + $0x8] sm:$0xff]   ;;  %v4467_v22 = vld [vmem:[%s5622_s11 + $0x18] sm:$0xff]   ;;  %v4476_v25 = vld [vmem:[%s5624_s13 + $0x20] sm:$0xff]  }
 0xa85   : > { %v2218_v50 = vpack.c.bf16 %v2208_v46, %v2207_v44  ;;  %v2217_v43 = vpack.c.bf16 %v2206_v53, %v2205_v52  ;;  %v1993_v1 = vadd.f32 %v4247_v26, %v1863_v33  ;;  %v4466_v26 = vld [vmem:[%s5622_s11 + $0x10] sm:$0xff]   ;;  %v4469_v60 = vld [vmem:[%s5624_s13 + $0x8] sm:$0xff]  }
 0xa86   : > { %4259 = vmatprep.subr.bf16.mxu1 %v2220_v34  ;;  %v2214_v63 = vpack.c.bf16 %v1980_v51, %v1977_v48  ;;  %v2215_v0 = vpack.c.bf16 %v1988_v9, %v1985_v62  ;;  %v1868_v30 = vpop.permute.xlu1 %1867  ;;  %v4477_v32 = vld [vmem:[%s5624_s13 + $0x28] sm:$0xff]  }
 0xa87   : > { %4260 = vmatpush3.bf16.msra.mxu1 %v2220_v34  ;;  %v1996_v14 = vadd.f32 %v4248_v15, %v1868_v30  ;;  %v4480_v34 = vld [vmem:[%s5624_s13 + $0x30] sm:$0xff]   ;;  %v2343_v44 = vpop.permute.xlu0 %2342 }
 0xa88   : > { %4261 = vmatprep.subr.bf16.mxu1 %v2219_v41 }
 0xa89   : > { %v2216_v19 = vpack.c.bf16 %v1996_v14, %v1993_v1 }
 0xa8b   : > { %4262 = vmatpush3.bf16.msra.mxu1 %v2219_v41  ;;  %v2348_v41 = vpop.permute.xlu1 %2347  ;;  %v2333_v52 = vpop.permute.xlu0 %2332 }
 0xa8c   : > { %4263 = vmatprep.subr.bf16.mxu1 %v2218_v50 }
 0xa8f   : > { %4264 = vmatpush3.bf16.msra.mxu1 %v2218_v50  ;;  %v2338_v15 = vpop.permute.xlu1 %2337  ;;  %v2323_v9 = vpop.permute.xlu0 %2322 }
 0xa90   : > { %4265 = vmatprep.subr.bf16.mxu1 %v2217_v43 }
 0xa93   : > { %4266 = vmatpush3.bf16.msra.mxu1 %v2217_v43  ;;  %v2328_v43 = vpop.permute.xlu1 %2327 }
 0xa96   : > { %4268 = vmatmul.mubr.msk.bf16.vlgmr.msra.gmra.mxu1 %vm982_vm2, %v2214_v63 }
 0xa97   : > { %4271 = vmatprep.mubr.msk.bf16.mxu1 %vm982_vm2, %v2215_v0  ;;  %v2318_v42 = vpop.permute.xlu1 %2317 }
 0xa9e   : > { %4272 = vmatmul.mubr.msk.bf16.gmra.mxu1 %vm982_vm2, %v2216_v19 }
 0xb56   : > { %v4269_v17 = vpop.f32.mrf.mxu1 }
 0xb57   : > { %v2300_v12 = vsub.f32 %v5060_v27, %v4269_v17 }
 0xb58   : > { %v2267_v2 = vpop.f32.mrf.mxu1 }
 0xb59   : > { %v2298_v16 = vsub.f32 %v5072_v5, %v2267_v2 }
 0xb5a   : > { %v4270_v45 = vpop.f32.mrf.mxu1 }
 0xb5b   : > { %v2301_v10 = vsub.f32 %v5051_v23, %v4270_v45 }
 0xb5c   : > { %v2270_v4 = vpop.f32.mrf.mxu1 }
 0xb5d   : > { %v2307_v58 = vpack.c.bf16 %v2301_v10, %v2300_v12  ;;  %v2299_v13 = vsub.f32 %v5064_v54, %v2270_v4 }
 0xb5e   : > { %v4273_v21 = vpop.f32.mrf.mxu1 }
 0xb5f   : > { %v2304_v39 = vsub.f32 %v5035_v36, %v4273_v21  ;;  %v2306_v18 = vpack.c.bf16 %v2299_v13, %v2298_v16  ;;  %v4482_v13 = vld [vmem:[%s5625_s14 + $0x30] sm:$0xff]   ;;  %v4483_v16 = vld [vmem:[%s5625_s14 + $0x38] sm:$0xff]  }
 0xb60   : > { %v2283_v28 = vpop.f32.mrf.mxu1 }
 0xb61   : > { %v2302_v61 = vsub.f32 %v5041_v29, %v2283_v28  ;;  %v2313_v28 = vpop.permute.xlu0 %2312 }
 0xb62   : > { %v4274_v37 = vpop.f32.mrf.mxu1 }
 0xb63   : > { %v2305_v6 = vsub.f32 %v5038_v40, %v4274_v37 }
 0xb64   : > { %v2286_v7 = vpop.f32.mrf.mxu1 }
 0xb65   : > { %v2309_v56 = vpack.c.bf16 %v2305_v6, %v2304_v39  ;;  %v2303_v8 = vsub.f32 %v5044_v3, %v2286_v7 }
 0xb67   : > { %v2308_v11 = vpack.c.bf16 %v2303_v8, %v2302_v61  ;;  %4275 = vmatprep.subr.bf16.mxu0 %v2309_v56 }
 0xb68   : > { %4276 = vmatpush3.bf16.msra.mxu0 %v2309_v56 }
 0xb69   : > { %4277 = vmatprep.subr.bf16.mxu0 %v2308_v11 }
 0xb6c   : > { %4278 = vmatpush3.bf16.msra.mxu0 %v2308_v11 }
 0xb6d   : > { %4279 = vmatprep.subr.bf16.mxu0 %v2307_v58 }
 0xb70   : > { %4280 = vmatpush3.bf16.msra.mxu0 %v2307_v58 }
 0xb71   : > { %4281 = vmatprep.subr.bf16.mxu0 %v2306_v18 }
 0xb74   : > { %4282 = vmatpush3.bf16.msra.mxu0 %v2306_v18 }
 0xb75   : > { %4315 = vmatprep.subr.bf16.mxu0 %v5048_v49 }
 0xb77   : > { %4284 = vmatmul.mubr.msk.bf16.vlgmr.msra.gmra.mxu0 %vm982_vm2, %v4465_v20 }
 0xb78   : > { %4316 = vmatpush3.bf16.msra.mxu0 %v5048_v49  ;;  %4287 = vmatprep.mubr.msk.bf16.mxu0 %vm982_vm2, %v4466_v26  ;;  %v4468_v49 = vld [vmem:[%s5624_s13] sm:$0xff]  }
 0xb79   : > { %4317 = vmatprep.subr.bf16.mxu0 %v5056_v24 }
 0xb7c   : > { %4318 = vmatpush3.bf16.msra.mxu0 %v5056_v24  ;;  %v4470_v24 = vld [vmem:[%s5625_s14] sm:$0xff]  }
 0xb7d   : > { %4319 = vmatprep.subr.bf16.mxu0 %v5068_v31  ;;  %4299 = vmatprep.mubr.msk.bf16.mxu1 %vm982_vm2, %v4470_v24 }
 0xb7f   : > { %4288 = vmatmul.mubr.msk.bf16.gmra.mxu0 %vm982_vm2, %v4467_v22 }
 0xb80   : > { %4320 = vmatpush3.bf16.msra.mxu0 %v5068_v31  ;;  %4323 = vmatprep.mubr.msk.bf16.mxu0 %vm982_vm2, %v4468_v49  ;;  %v4472_v31 = vld [vmem:[%s5624_s13 + $0x10] sm:$0xff]  }
 0xb81   : > { %4321 = vmatprep.subr.bf16.mxu0 %v5077_v35 }
 0xb84   : > { %4322 = vmatpush3.bf16.msra.mxu0 %v5077_v35  ;;  %v4473_v35 = vld [vmem:[%s5624_s13 + $0x18] sm:$0xff]  }
 0xb87   : > { %4324 = vmatmul.mubr.msk.bf16.vlgmr.msra.gmra.mxu0 %vm982_vm2, %v4469_v60 }
 0xb88   : > { %4327 = vmatprep.mubr.msk.bf16.mxu0 %vm982_vm2, %v4472_v31 }
 0xb8f   : > { %4328 = vmatmul.mubr.msk.bf16.gmra.mxu0 %vm982_vm2, %v4473_v35 }
 0xb90   : > { %4331 = vmatprep.mubr.msk.bf16.mxu0 %vm982_vm2, %v4476_v25 }
 0xb97   : > { %4332 = vmatmul.mubr.msk.bf16.gmra.mxu0 %vm982_vm2, %v4477_v32 }
 0xb98   : > { %4335 = vmatprep.mubr.msk.bf16.mxu0 %vm982_vm2, %v4480_v34 }
 0xb9f   : > { %4336 = vmatmul.mubr.msk.bf16.gmra.mxu0 %vm982_vm2, %v4481_v38  ;;  %v2910_v38 = vpop.permute.xlu0 %2909 }
 0xc37   : > { %v4285_v46 = vpop.f32.mrf.mxu0 }
 0xc38   : > { %v2425_v30 = vadd.f32 %v4285_v46, %v2323_v9 }
 0xc39   : > { %v2416_v47 = vpop.f32.mrf.mxu0 }
 0xc3a   : > { %v2449_v37 = vmax.f32 %v2425_v30, 0.0  ;;  %v2417_v39 = vadd.f32 %v2416_v47, %v2313_v28  ;;  %v2915_v47 = vpop.permute.xlu1 %2914 }
 0xc3b   : > { %v4286_v50 = vpop.f32.mrf.mxu0 }
 0xc3c   : > { %v2428_v48 = vadd.f32 %v4286_v50, %v2328_v43  ;;  %v2457_v11 = vadd.f32 %v2449_v37, %v5060_v27  ;;  %v4475_v27 = vld [vmem:[%s5625_s14 + $0x18] sm:$0xff]  }
 0xc3d   : > { %v2419_v53 = vpop.f32.mrf.mxu0 }
 0xc3e   : > { %v2450_v17 = vmax.f32 %v2428_v48, 0.0  ;;  %v2420_v2 = vadd.f32 %v2419_v53, %v2318_v42  ;;  %v2905_v43 = vpop.permute.xlu1 %2904 }
 0xc3f   : > { %v4289_v57 = vpop.f32.mrf.mxu0 }
 0xc40   : > { %v2441_v55 = vadd.f32 %v4289_v57, %v2343_v44  ;;  %v2458_v56 = vadd.f32 %v2450_v17, %v5051_v23  ;;  %v2448_v8 = vmax.f32 %v2420_v2, 0.0  ;;  %v4474_v23 = vld [vmem:[%s5625_s14 + $0x10] sm:$0xff]  }
 0xc41   : > { %v2432_v51 = vpop.f32.mrf.mxu0 }
 0xc42   : > { %v2433_v59 = vadd.f32 %v2432_v51, %v2333_v52  ;;  %v2453_v63 = vmax.f32 %v2441_v55, 0.0  ;;  %v2496_v12 = vpack.c.bf16 %v2458_v56, %v2457_v11  ;;  %v2900_v52 = vpop.permute.xlu0 %2899 }
 0xc43   : > { %v4290_v62 = vpop.f32.mrf.mxu0 }
 0xc44   : > { %v2444_v0 = vadd.f32 %v4290_v62, %v2348_v41  ;;  %v2451_v14 = vmax.f32 %v2433_v59, 0.0  ;;  %v2461_v45 = vadd.f32 %v2453_v63, %v5035_v36  ;;  %v2447_v36 = vmax.f32 %v2417_v39, 0.0  ;;  %v2895_v63 = vpop.permute.xlu1 %2894 }
 0xc45   : > { %v2435_v33 = vpop.f32.mrf.mxu0 }
 0xc46   : > { %v2454_v1 = vmax.f32 %v2444_v0, 0.0  ;;  %v2436_v19 = vadd.f32 %v2435_v33, %v2338_v15  ;;  %v2459_v6 = vadd.f32 %v2451_v14, %v5041_v29  ;;  %v2455_v58 = vadd.f32 %v2447_v36, %v5072_v5  ;;  %v4479_v5 = vld [vmem:[%s5625_s14 + $0x28] sm:$0xff]   ;;  %v2890_v59 = vpop.permute.xlu0 %2889 }
 0xc47   : > { %v5380_v18 = vpop.f32.mrf.mxu0 }
 0xc48   : > { %v2462_v4 = vadd.f32 %v2454_v1, %v5038_v40  ;;  %v2452_v21 = vmax.f32 %v2436_v19, 0.0  ;;  %v2456_v40 = vadd.f32 %v2448_v8, %v5064_v54  ;;  %v4478_v54 = vld [vmem:[%s5625_s14 + $0x20] sm:$0xff]   ;;  %v2885_v28 = vpop.permute.xlu1 %2884 }
 0xc49   : > { %v5382_v20 = vpop.f32.mrf.mxu0 }
 0xc4a   : > { %v2460_v7 = vadd.f32 %v2452_v21, %v5044_v3  ;;  %v2498_v61 = vpack.c.bf16 %v2462_v4, %v2461_v45  ;;  %v2495_v29 = vpack.c.bf16 %v2456_v40, %v2455_v58  ;;  %v4471_v3 = vld [vmem:[%s5625_s14 + $0x8] sm:$0xff]   ;;  %v2880_v14 = vpop.permute.xlu0 %2879 }
 0xc4b   : > { %v5384_v26 = vpop.f32.mrf.mxu0 }
 0xc4c   : > { %4291 = vmatprep.subr.bf16.mxu1 %v2498_v61  ;;  %v2497_v10 = vpack.c.bf16 %v2460_v7, %v2459_v6 }
 0xc4d   : > { %4292 = vmatpush3.bf16.msra.mxu1 %v2498_v61  ;;  %v5386_v22 = vpop.f32.mrf.mxu0 }
 0xc4e   : > { %4293 = vmatprep.subr.bf16.mxu1 %v2497_v10  ;;  %v2870_v6 = vpop.permute.xlu0 %2869 }
 0xc4f   : > { %v4329_v49 = vpop.f32.mrf.mxu0 }
 0xc51   : > { %4294 = vmatpush3.bf16.msra.mxu1 %v2497_v10  ;;  %v5388_v60 = vpop.f32.mrf.mxu0 }
 0xc52   : > { %4295 = vmatprep.subr.bf16.mxu1 %v2496_v12 }
 0xc53   : > { %v5390_v24 = vpop.f32.mrf.mxu0 }
 0xc55   : > { %4296 = vmatpush3.bf16.msra.mxu1 %v2496_v12  ;;  %v5392_v31 = vpop.f32.mrf.mxu0 }
 0xc56   : > { %4297 = vmatprep.subr.bf16.mxu1 %v2495_v29 }
 0xc57   : > { %v4333_v32 = vpop.f32.mrf.mxu0 }
 0xc59   : > { %4298 = vmatpush3.bf16.msra.mxu1 %v2495_v29  ;;  %v2790_v44 = vpop.f32.mrf.mxu0 }
 0xc5b   : > { %v4334_v50 = vpop.f32.mrf.mxu0 }
 0xc5c   : > { %4300 = vmatmul.mubr.msk.bf16.vlgmr.msra.gmra.mxu1 %vm982_vm2, %v4471_v3 }
 0xc5d   : > { %4303 = vmatprep.mubr.msk.bf16.mxu1 %vm982_vm2, %v4474_v23  ;;  %v2793_v55 = vpop.f32.mrf.mxu0 }
 0xc5f   : > { %v4337_v48 = vpop.f32.mrf.mxu0 }
 0xc61   : > { %v2806_v30 = vpop.f32.mrf.mxu0 }
 0xc63   : > { %v4338_v2 = vpop.f32.mrf.mxu0 }
 0xc64   : > { %4304 = vmatmul.mubr.msk.bf16.gmra.mxu1 %vm982_vm2, %v4475_v27 }
 0xc65   : > { %4307 = vmatprep.mubr.msk.bf16.mxu1 %vm982_vm2, %v4478_v54  ;;  %v2809_v36 = vpop.f32.mrf.mxu0 }
 0xc6c   : > { %4308 = vmatmul.mubr.msk.bf16.gmra.mxu1 %vm982_vm2, %v4479_v5 }
 0xc6d   : > { %4311 = vmatprep.mubr.msk.bf16.mxu1 %vm982_vm2, %v4482_v13 }
 0xc74   : > { %4312 = vmatmul.mubr.msk.bf16.gmra.mxu1 %vm982_vm2, %v4483_v16 }
 0xd1c   : > { %v5394_v35 = vpop.f32.mrf.mxu1 }
 0xd1e   : > { %v5396_v25 = vpop.f32.mrf.mxu1 }
 0xd20   : > { %v5398_v34 = vpop.f32.mrf.mxu1 }
 0xd22   : > { %v5400_v41 = vpop.f32.mrf.mxu1 }
 0xd24   : > { %v4305_v46 = vpop.f32.mrf.mxu1 }
 0xd25   : > { %v2783_v8 = vadd.f32 %v4329_v49, %v4305_v46 }
 0xd26   : > { %v2613_v15 = vpop.f32.mrf.mxu1 }
 0xd27   : > { %v2923_v49 = vadd.f32 %v2870_v6, %v2783_v8  ;;  %v2762_v6 = vadd.f32 %v5386_v22, %v5400_v41 }
 0xd28   : > { %v4306_v53 = vpop.f32.mrf.mxu1 }
 0xd29   : > { %vm2939_vm12 = vcmp.gt.f32.partialorder %v2923_v49, 0.0 }
 0xd2a   : > { %v5402_v57 = vpop.f32.mrf.mxu1 }
 0xd2c   : > { %v4309_v51 = vpop.f32.mrf.mxu1 }
 0xd2d   : > { %v2799_v0 = vadd.f32 %v4333_v32, %v4309_v51  ;;  %v2875_v32 = vpop.permute.xlu1 %2874 }
 0xd2e   : > { %v2629_v9 = vpop.f32.mrf.mxu1 }
 0xd2f   : > { %v2927_v42 = vadd.f32 %v2890_v59, %v2799_v0  ;;  %v2791_v17 = vadd.f32 %v2790_v44, %v2629_v9  ;;  %v2775_v44 = vadd.f32 %v5388_v60, %v2613_v15  ;;  %v2767_v60 = vadd.f32 %v5380_v18, %v5394_v35 }
 0xd30   : > { %v4310_v62 = vpop.f32.mrf.mxu1  ;;  %v2955_v15 = vmul.f32 0.2, %v2923_v49  ;;  %v2759_v35 = vadd.f32 %v5382_v20, %v5396_v25 }
 0xd31   : > { %v2802_v37 = vadd.f32 %v4334_v50, %v4310_v62  ;;  %v2959_v10 = vmul.f32 0.2, %v2927_v42  ;;  %v2925_v11 = vadd.f32 %v2880_v14, %v2791_v17  ;;  %vm2943_vm7 = vcmp.gt.f32.partialorder %v2927_v42, 0.0  ;;  %v2865_v62 = vpop.permute.xlu1 %2864 }
 0xd32   : > { %v2632_v33 = vpop.f32.mrf.mxu1  ;;  %v2786_v50 = vadd.f32 %v5390_v24, %v4306_v53 }
 0xd33   : > { %v2928_v23 = vadd.f32 %v2895_v63, %v2802_v37  ;;  %v2794_v27 = vadd.f32 %v2793_v55, %v2632_v33  ;;  %vm2941_vm10 = vcmp.gt.f32.partialorder %v2925_v11, 0.0  ;;  %v2778_v33 = vadd.f32 %v5392_v31, %v5402_v57 }
 0xd34   : > { %v4313_v1 = vpop.f32.mrf.mxu1  ;;  %v2924_v24 = vadd.f32 %v2875_v32, %v2786_v50  ;;  %v3474_v32 = vld [vmem:[%s5629_s18 + $0x70] sm:$0xff] }
 0xd35   : > { %v2815_v19 = vadd.f32 %v4337_v48, %v4313_v1  ;;  %v2926_v59 = vadd.f32 %v2885_v28, %v2794_v27  ;;  %v2975_v48 = vsel %vm2943_vm7, %v2927_v42, %v2959_v10  ;;  %vm2944_vm9 = vcmp.gt.f32.partialorder %v2928_v23, 0.0  ;;  %v2855_v28 = vpop.permute.xlu1 %2854  ;;  %v3470_v50 = vld [vmem:[%s5629_s18 + $0x50] sm:$0xff] }
 0xd36   : > { %v2645_v45 = vpop.f32.mrf.mxu1  ;;  %v3011_v0 = vsel %vm982_vm2, %v2975_v48, -inf  ;;  %v2770_v42 = vadd.f32 %v5384_v26, %v5398_v34  ;;  %v2956_v31 = vmul.f32 0.2, %v2924_v24  ;;  %v2922_v57 = vadd.f32 %v2865_v62, %v2778_v33  ;;  %v4493_v48 = vld [vmem:[%s5627_s16 + $0x8] sm:$0xff]   ;;  %v4496_v62 = vld [vmem:[%s5627_s16 + $0x20] sm:$0xff]  }
 0xd37   : > { %v2931_v4 = vadd.f32 %v2910_v38, %v2815_v19  ;;  %v2807_v21 = vadd.f32 %v2806_v30, %v2645_v45  ;;  %v2860_v38 = vpop.permute.xlu0 %2859  ;;  %v2958_v14 = vmul.f32 0.2, %v2926_v59  ;;  %vm2942_vm11 = vcmp.gt.f32.partialorder %v2926_v59, 0.0 }
 0xd38   : > { %v4314_v39 = vpop.f32.mrf.mxu1  ;;  %v2921_v63 = vadd.f32 %v2860_v38, %v2775_v44  ;;  %vm2940_vm13 = vcmp.gt.f32.partialorder %v2924_v24, 0.0  ;;  %v2920_v25 = vadd.f32 %v2855_v28, %v2770_v42  ;;  %vm2938_vm15 = vcmp.gt.f32.partialorder %v2922_v57, 0.0  ;;  %v3475_v38 = vld [vmem:[%s5629_s18 + $0x78] sm:$0xff]  ;;  %v3473_v44 = vld [vmem:[%s5629_s18 + $0x68] sm:$0xff] }
 0xd39   : > { %v2963_v7 = vmul.f32 0.2, %v2931_v4  ;;  %v2929_v61 = vadd.f32 %v2900_v52, %v2807_v21  ;;  %v2818_v56 = vadd.f32 %v4338_v2, %v4314_v39  ;;  %vm2947_vm4 = vcmp.gt.f32.partialorder %v2931_v4, 0.0  ;;  %v2845_v8 = vpop.permute.xlu1 %2844 }
 0xd3a   : > { %v2648_v40 = vpop.f32.mrf.mxu1  ;;  %v2957_v52 = vmul.f32 0.2, %v2925_v11  ;;  %v2953_v17 = vmul.f32 0.2, %v2921_v63  ;;  %v2971_v21 = vsel %vm2939_vm12, %v2923_v49, %v2955_v15  ;;  %vm2937_vm14 = vcmp.gt.f32.partialorder %v2921_v63, 0.0  ;;  %v4484_v49 = vld [vmem:[%s5628_s17] sm:$0xff]  }
 0xd3b   : > { %v2961_v12 = vmul.f32 0.2, %v2929_v61  ;;  %v2932_v58 = vadd.f32 %v2915_v47, %v2818_v56  ;;  %v2810_v29 = vadd.f32 %v2809_v36, %v2648_v40  ;;  %v2979_v3 = vsel %vm2947_vm4, %v2931_v4, %v2963_v7  ;;  %v2850_v30 = vpop.permute.xlu0 %2849  ;;  %4355 = vmatprep.mubr.bf16.mxu1 %v4484_v49  ;;  %v4495_v15 = vld [vmem:[%s5627_s16 + $0x18] sm:$0xff]  }
 0xd3c   : > { %v3023_v54 = vsel %vm982_vm2, %v2979_v3, -inf  ;;  %vm2945_vm5 = vcmp.gt.f32.partialorder %v2929_v61, 0.0  ;;  %v2973_v19 = vsel %vm2941_vm10, %v2925_v11, %v2957_v52  ;;  %v2919_v18 = vadd.f32 %v2850_v30, %v2767_v60  ;;  %v3469_v52 = vld [vmem:[%s5629_s18 + $0x48] sm:$0xff]  ;;  %v4494_v60 = vld [vmem:[%s5627_s16 + $0x10] sm:$0xff]  }
 0xd3d   : > { %v2964_v5 = vmul.f32 0.2, %v2932_v58  ;;  %v2930_v13 = vadd.f32 %v2905_v43, %v2810_v29  ;;  %3024 = vmax.xlane.f32.xlu0 %v3023_v54  ;;  %vm2948_vm6 = vcmp.gt.f32.partialorder %v2932_v58, 0.0  ;;  %v2977_v16 = vsel %vm2945_vm5, %v2929_v61, %v2961_v12 }
 0xd3e   : > { %v3017_v51 = vsel %vm982_vm2, %v2977_v16, -inf  ;;  %v2960_v43 = vmul.f32 0.2, %v2928_v23  ;;  %v3005_v45 = vsel %vm982_vm2, %v2973_v19, -inf  ;;  %v2974_v4 = vsel %vm2942_vm11, %v2926_v59, %v2958_v14 }
 0xd3f   : > { %v2962_v46 = vmul.f32 0.2, %v2930_v13  ;;  %v2980_v47 = vsel %vm2948_vm6, %v2932_v58, %v2964_v5  ;;  %vm2946_vm8 = vcmp.gt.f32.partialorder %v2930_v13, 0.0  ;;  %v2840_v37 = vpop.permute.xlu0 %2839  ;;  %v2951_v39 = vmul.f32 0.2, %v2919_v18 }
 0xd40   : > { %v3026_v55 = vsel %vm982_vm2, %v2980_v47, -inf  ;;  %v2976_v1 = vsel %vm2944_vm9, %v2928_v23, %v2960_v43  ;;  %v2917_v20 = vadd.f32 %v2840_v37, %v2759_v35  ;;  %v3008_v26 = vsel %vm982_vm2, %v2974_v4, -inf  ;;  %v3471_v47 = vld [vmem:[%s5629_s18 + $0x58] sm:$0xff]  ;;  %v4492_v43 = vld [vmem:[%s5627_s16] sm:$0xff]  }
 0xd41   : > { %3027 = vmax.xlane.f32.xlu1 %v3026_v55  ;;  %3018 = vmax.xlane.f32.xlu0 %v3017_v51  ;;  %v2978_v9 = vsel %vm2946_vm8, %v2930_v13, %v2962_v46  ;;  %v3014_v2 = vsel %vm982_vm2, %v2976_v1, -inf  ;;  %v2999_v34 = vsel %vm982_vm2, %v2971_v21, -inf  ;;  %v2954_v7 = vmul.f32 0.2, %v2922_v57  ;;  %v3472_v46 = vld [vmem:[%s5629_s18 + $0x60] sm:$0xff] }
 0xd42   : > { %v3020_v53 = vsel %vm982_vm2, %v2978_v9, -inf  ;;  %v2972_v61 = vsel %vm2940_vm13, %v2924_v24, %v2956_v31  ;;  %v2969_v56 = vsel %vm2937_vm14, %v2921_v63, %v2953_v17  ;;  %vm2935_vm3 = vcmp.gt.f32.partialorder %v2919_v18, 0.0  ;;  %v3468_v55 = vld [vmem:[%s5629_s18 + $0x40] sm:$0xff]  ;;  %4373 = vmatprep.mubr.msk.bf16.mxu0 %vm812_vm0, %v4492_v43  ;;  %v4497_v63 = vld [vmem:[%s5627_s16 + $0x28] sm:$0xff]   ;;  %v4498_v24 = vld [vmem:[%s5627_s16 + $0x30] sm:$0xff]  }
 0xd43   : > { %v2949_v10 = vmul.f32 0.2, %v2917_v20  ;;  %v3002_v11 = vsel %vm982_vm2, %v2972_v61, -inf  ;;  %v2993_v36 = vsel %vm982_vm2, %v2969_v56, -inf  ;;  %v2952_v40 = vmul.f32 0.2, %v2920_v25 }
 0xd44   : > { %v2918_v12 = vadd.f32 %v2845_v8, %v2762_v6  ;;  %v2970_v58 = vsel %vm2938_vm15, %v2922_v57, %v2954_v7  ;;  %v2967_v29 = vsel %vm2935_vm3, %v2919_v18, %v2951_v39  ;;  %vm2936_vm4 = vcmp.gt.f32.partialorder %v2920_v25, 0.0  ;;  %v3214_v51 = vld [vmem:[%s5634_s23] sm:$0xff]  ;;  %v4485_v7 = vld [vmem:[%s5628_s17 + $0x8] sm:$0xff]   ;;  %v4486_v61 = vld [vmem:[%s5628_s17 + $0x10] sm:$0xff]  }
 0xd45   : > { %3021 = vmax.xlane.f32.xlu0 %v3020_v53  ;;  %3012 = vmax.xlane.f32.xlu1 %v3011_v0  ;;  %vm2933_vm5 = vcmp.gt.f32.partialorder %v2917_v20, 0.0  ;;  %v2996_v22 = vsel %vm982_vm2, %v2970_v58, -inf  ;;  %v2987_v41 = vsel %vm982_vm2, %v2967_v29, -inf  ;;  %v2968_v23 = vsel %vm2936_vm4, %v2920_v25, %v2952_v40  ;;  %v4499_v53 = vld [vmem:[%s5627_s16 + $0x38] sm:$0xff]   ;;  %v4488_v8 = vld [vmem:[%s5628_s17 + $0x20] sm:$0xff]   ;;  %v3461_v43 = vld [vmem:[%s5629_s18 + $0x8] sm:$0xff] }
 0xd46   : > { %v2950_v3 = vmul.f32 0.2, %v2918_v12  ;;  %v2965_v27 = vsel %vm2933_vm5, %v2917_v20, %v2949_v10  ;;  %vm2934_vm6 = vcmp.gt.f32.partialorder %v2918_v12, 0.0  ;;  %v2990_v54 = vsel %vm982_vm2, %v2968_v23, -inf  ;;  %v4487_v56 = vld [vmem:[%s5628_s17 + $0x18] sm:$0xff]   ;;  %v4489_v10 = vld [vmem:[%s5628_s17 + $0x28] sm:$0xff]  }
 0xd47   : > { %v2981_v5 = vsel %vm982_vm2, %v2965_v27, -inf  ;;  %v3215_v59 = vpack.c.bf16 %v3214_v51, %v3214_v51  ;;  %v3460_v51 = vld [vmem:[%s5629_s18] sm:$0xff] }
 0xd48   : > { %v2966_v13 = vsel %vm2934_vm6, %v2918_v12, %v2950_v3 }
 0xd49   : > { %3015 = vmax.xlane.f32.xlu0 %v3014_v2  ;;  %3006 = vmax.xlane.f32.xlu1 %v3005_v45  ;;  %v2984_v16 = vsel %vm982_vm2, %v2966_v13, -inf  ;;  %v3361_v9 = vsel %vm825_vm1, %v3215_v59, 0 }
 0xd4a   : > { %4426 = vmatprep.subr.msk.bf16.mxu0 %vm825_vm1, %v3215_v59  ;;  %v3610_v59 = vld [vmem:[%s5631_s20 + $0x30] sm:$0xff] }
 0xd4b   : > { %4372 = vmatpush3.bf16.msra.mxu0 %v3361_v9  ;;  %v3611_v9 = vld [vmem:[%s5631_s20 + $0x38] sm:$0xff] }
 0xd4d   : > { %3009 = vmax.xlane.f32.xlu0 %v3008_v26  ;;  %3000 = vmax.xlane.f32.xlu1 %v2999_v34 }
 0xd4e   : > { %4374 = vmatmul.mubr.msk.bf16.vlgmr.msra.gmra.mxu0 %vm812_vm0, %v4493_v48  ;;  %v3608_v48 = vld [vmem:[%s5631_s20 + $0x20] sm:$0xff] }
 0xd4f   : > { %4377 = vmatprep.mubr.msk.bf16.mxu0 %vm812_vm0, %v4494_v60  ;;  %v4500_v60 = vld [vmem:[%s5630_s19] sm:$0xff]  }
 0xd51   : > { %3003 = vmax.xlane.f32.xlu0 %v3002_v11  ;;  %2994 = vmax.xlane.f32.xlu1 %v2993_v36  ;;  %v4490_v11 = vld [vmem:[%s5628_s17 + $0x30] sm:$0xff]   ;;  %v4491_v36 = vld [vmem:[%s5628_s17 + $0x38] sm:$0xff]  }
 0xd55   : > { %2997 = vmax.xlane.f32.xlu0 %v2996_v22  ;;  %2988 = vmax.xlane.f32.xlu1 %v2987_v41 }
 0xd56   : > { %4378 = vmatmul.mubr.msk.bf16.gmra.mxu0 %vm812_vm0, %v4495_v15  ;;  %v3609_v15 = vld [vmem:[%s5631_s20 + $0x28] sm:$0xff] }
 0xd57   : > { %4381 = vmatprep.mubr.msk.bf16.mxu0 %vm812_vm0, %v4496_v62  ;;  %v3606_v62 = vld [vmem:[%s5631_s20 + $0x10] sm:$0xff] }
 0xd59   : > { %2991 = vmax.xlane.f32.xlu0 %v2990_v54  ;;  %2982 = vmax.xlane.f32.xlu1 %v2981_v5 }
 0xd5d   : > { %2985 = vmax.xlane.f32.xlu0 %v2984_v16 }
 0xd5e   : > { %4382 = vmatmul.mubr.msk.bf16.gmra.mxu0 %vm812_vm0, %v4497_v63  ;;  %v3607_v63 = vld [vmem:[%s5631_s20 + $0x18] sm:$0xff] }
 0xd5f   : > { %4385 = vmatprep.mubr.msk.bf16.mxu0 %vm812_vm0, %v4498_v24  ;;  %v3604_v24 = vld [vmem:[%s5631_s20] sm:$0xff] }
 0xd66   : > { %4386 = vmatmul.mubr.msk.bf16.gmra.mxu0 %vm812_vm0, %v4499_v53  ;;  %v3605_v53 = vld [vmem:[%s5631_s20 + $0x8] sm:$0xff]  ;;  %vm4584_vm0 = vmmov 0  }
 0xd6a   : > { %3548 = vperm.xlu1 %4439, %v3474_v32  }
 0xd6e   : > { %3553 = vperm.xlu1 %4439, %v3475_v38  }
 0xd72   : > { %3543 = vperm.xlu1 %4439, %v3473_v44   ;;  %v3466_v44 = vld [vmem:[%s5629_s18 + $0x30] sm:$0xff] }
 0xd73   : > { %3538 = vperm.xlu0 %4438, %v3472_v46   ;;  %v3467_v46 = vld [vmem:[%s5629_s18 + $0x38] sm:$0xff] }
 0xd76   : > { %3533 = vperm.xlu1 %4439, %v3471_v47   ;;  %v3464_v47 = vld [vmem:[%s5629_s18 + $0x20] sm:$0xff] }
 0xd77   : > { %3528 = vperm.xlu0 %4438, %v3470_v50   ;;  %v3465_v50 = vld [vmem:[%s5629_s18 + $0x28] sm:$0xff] }
 0xd7a   : > { %3523 = vperm.xlu1 %4439, %v3469_v52   ;;  %v3462_v52 = vld [vmem:[%s5629_s18 + $0x10] sm:$0xff] }
 0xd7b   : > { %3518 = vperm.xlu0 %4438, %v3468_v55   ;;  %v3463_v55 = vld [vmem:[%s5629_s18 + $0x18] sm:$0xff] }
 0xdc6   : > { %v3025_v0 = vpop.xlane.xlu0 %3024 }
 0xdca   : > { %v3028_v30 = vpop.xlane.xlu1 %3027  ;;  %v3019_v33 = vpop.xlane.xlu0 %3018 }
 0xdcb   : > { %v3052_v14 = vpack.c.bf16 %v3028_v30, %v3025_v0  ;;  %v3754_v0 = vld [vmem:[%s5633_s22] sm:$0xff] }
 0xdcd   : > { %4339 = vmatprep.subr.bf16.mxu1 %v3052_v14 }
 0xdce   : > { %v3013_v1 = vpop.xlane.xlu1 %3012  ;;  %4340 = vmatpush3.bf16.msra.mxu1 %v3052_v14  ;;  %v3022_v19 = vpop.xlane.xlu0 %3021 }
 0xdcf   : > { %v3051_v18 = vpack.c.bf16 %v3022_v19, %v3019_v33 }
 0xdd1   : > { %4341 = vmatprep.subr.bf16.mxu1 %v3051_v18 }
 0xdd2   : > { %v3007_v35 = vpop.xlane.xlu1 %3006  ;;  %4342 = vmatpush3.bf16.msra.mxu1 %v3051_v18  ;;  %v3016_v42 = vpop.xlane.xlu0 %3015 }
 0xdd3   : > { %v3050_v17 = vpack.c.bf16 %v3016_v42, %v3013_v1 }
 0xdd5   : > { %4343 = vmatprep.subr.bf16.mxu1 %v3050_v17 }
 0xdd6   : > { %v3001_v2 = vpop.xlane.xlu1 %3000  ;;  %4344 = vmatpush3.bf16.msra.mxu1 %v3050_v17  ;;  %v3010_v45 = vpop.xlane.xlu0 %3009 }
 0xdd7   : > { %v3049_v31 = vpack.c.bf16 %v3010_v45, %v3007_v35 }
 0xdd9   : > { %4345 = vmatprep.subr.bf16.mxu1 %v3049_v31 }
 0xdda   : > { %v2995_v57 = vpop.xlane.xlu1 %2994  ;;  %4346 = vmatpush3.bf16.msra.mxu1 %v3049_v31  ;;  %v3004_v4 = vpop.xlane.xlu0 %3003 }
 0xddb   : > { %v3048_v21 = vpack.c.bf16 %v3004_v4, %v3001_v2 }
 0xddd   : > { %4347 = vmatprep.subr.bf16.mxu1 %v3048_v21 }
 0xdde   : > { %4348 = vmatpush3.bf16.msra.mxu1 %v3048_v21  ;;  %v2998_v28 = vpop.xlane.xlu0 %2997  ;;  %v2989_v39 = vpop.xlane.xlu1 %2988 }
 0xddf   : > { %v3047_v37 = vpack.c.bf16 %v2998_v28, %v2995_v57 }
 0xde1   : > { %4349 = vmatprep.subr.bf16.mxu1 %v3047_v37 }
 0xde2   : > { %4350 = vmatpush3.bf16.msra.mxu1 %v3047_v37  ;;  %v2992_v20 = vpop.xlane.xlu0 %2991  ;;  %v2983_v26 = vpop.xlane.xlu1 %2982 }
 0xde3   : > { %v3046_v25 = vpack.c.bf16 %v2992_v20, %v2989_v39 }
 0xde5   : > { %4351 = vmatprep.subr.bf16.mxu1 %v3046_v25 }
 0xde6   : > { %4352 = vmatpush3.bf16.msra.mxu1 %v3046_v25  ;;  %v2986_v34 = vpop.xlane.xlu0 %2985  ;;  %v3549_v18 = vpop.permute.xlu1 %3548 }
 0xde7   : > { %v3045_v6 = vpack.c.bf16 %v2986_v34, %v2983_v26 }
 0xde9   : > { %4353 = vmatprep.subr.bf16.mxu1 %v3045_v6 }
 0xdea   : > { %4354 = vmatpush3.bf16.msra.mxu1 %v3045_v6  ;;  %v3554_v42 = vpop.permute.xlu1 %3553 }
 0xded   : > { %4356 = vmatmul.mubr.bf16.vlgmr.msra.gmra.mxu1 %v4485_v7 }
 0xdee   : > { %4359 = vmatprep.mubr.bf16.mxu1 %v4486_v61  ;;  %v3539_v2 = vpop.permute.xlu0 %3538  ;;  %v3544_v31 = vpop.permute.xlu1 %3543 }
 0xdf2   : > { %v3529_v57 = vpop.permute.xlu0 %3528  ;;  %v3534_v21 = vpop.permute.xlu1 %3533 }
 0xdf5   : > { %4360 = vmatmul.mubr.bf16.gmra.mxu1 %v4487_v56 }
 0xdf6   : > { %4363 = vmatprep.mubr.bf16.mxu1 %v4488_v8  ;;  %v3519_v37 = vpop.permute.xlu0 %3518  ;;  %v3524_v20 = vpop.permute.xlu1 %3523 }
 0xdfd   : > { %4364 = vmatmul.mubr.bf16.gmra.mxu1 %v4489_v10 }
 0xdfe   : > { %4367 = vmatprep.mubr.bf16.mxu1 %v4490_v11 }
 0xe05   : > { %4368 = vmatmul.mubr.bf16.gmra.mxu1 %v4491_v36 }
 0xe06   : > { %4405 = vmatprep.mubr.bf16.mxu1 %v4500_v60 }
 0xe0e   : > { %v5571_v30 = vpop.f32.mrf.mxu0 }
 0xe10   : > { %v5573_v33 = vpop.f32.mrf.mxu0 }
 0xe12   : > { %v5575_v14 = vpop.f32.mrf.mxu0 }
 0xe14   : > { %v5577_v1 = vpop.f32.mrf.mxu0 }
 0xe16   : > { %v4379_v19 = vpop.f32.mrf.mxu0 }
 0xe18   : > { %v5579_v35 = vpop.f32.mrf.mxu0 }
 0xe1a   : > { %v4380_v17 = vpop.f32.mrf.mxu0 }
 0xe1c   : > { %v5581_v45 = vpop.f32.mrf.mxu0 }
 0xe1e   : > { %v4383_v4 = vpop.f32.mrf.mxu0 }
 0xe20   : > { %v3429_v28 = vpop.f32.mrf.mxu0 }
 0xe22   : > { %v4384_v39 = vpop.f32.mrf.mxu0 }
 0xe24   : > { %v3432_v26 = vpop.f32.mrf.mxu0 }
 0xe26   : > { %v4387_v7 = vpop.f32.mrf.mxu0 }
 0xe28   : > { %v3445_v56 = vpop.f32.mrf.mxu0 }
 0xe2a   : > { %v4388_v36 = vpop.f32.mrf.mxu0 }
 0xead   : > { %v4357_v40 = vpop.f32.mrf.mxu1 }
 0xeaf   : > { %v3135_v12 = vpop.f32.mrf.mxu1 }
 0xeb1   : > { %v4358_v58 = vpop.f32.mrf.mxu1 }
 0xeb3   : > { %v3138_v29 = vpop.f32.mrf.mxu1 }
 0xeb5   : > { %v4361_v22 = vpop.f32.mrf.mxu1 }
 0xeb7   : > { %v3151_v41 = vpop.f32.mrf.mxu1 }
 0xeb9   : > { %v4362_v3 = vpop.f32.mrf.mxu1 }
 0xebb   : > { %v3154_v23 = vpop.f32.mrf.mxu1 }
 0xebd   : > { %v4365_v27 = vpop.f32.mrf.mxu1 }
 0xebe   : > { %3268 = vperm.xlu0 %4438, %v4365_v27  }
 0xebf   : > { %v3167_v54 = vpop.f32.mrf.mxu1 }
 0xec1   : > { %v4366_v5 = vpop.f32.mrf.mxu1 }
 0xec2   : > { %3258 = vperm.xlu0 %4438, %v3167_v54   ;;  %3273 = vperm.xlu1 %4439, %v4366_v5  }
 0xec3   : > { %v3170_v13 = vpop.f32.mrf.mxu1 }
 0xec5   : > { %v4369_v16 = vpop.f32.mrf.mxu1 }
 0xec6   : > { %3263 = vperm.xlu1 %4439, %v3170_v13  }
 0xec7   : > { %v3183_v32 = vpop.f32.mrf.mxu1 }
 0xec8   : > { %3278 = vperm.xlu0 %4438, %v3183_v32  }
 0xec9   : > { %v4370_v49 = vpop.f32.mrf.mxu1 }
 0xeca   : > { %3288 = vperm.xlu1 %4439, %v4369_v16   ;;  %v3448_v16 = vpop.f32.mrf.mxu0 }
 0xecb   : > { %v3186_v38 = vpop.f32.mrf.mxu1 }
 0xecc   : > { %3293 = vperm.xlu0 %4438, %v4370_v49  }
 0xece   : > { %3253 = vperm.xlu1 %4439, %v4362_v3  }
 0xed0   : > { %3248 = vperm.xlu0 %4438, %v4361_v22  }
 0xed2   : > { %3283 = vperm.xlu1 %4439, %v3186_v38  }
 0xed4   : > { %3508 = vperm.xlu0 %4438, %v3466_v44  }
 0xed6   : > { %3513 = vperm.xlu1 %4439, %v3467_v46  }
 0xed8   : > { %3238 = vperm.xlu0 %4438, %v3151_v41  }
 0xeda   : > { %3243 = vperm.xlu1 %4439, %v3154_v23  }
 0xedc   : > { %3498 = vperm.xlu0 %4438, %v3464_v47  }
 0xede   : > { %3503 = vperm.xlu1 %4439, %v3465_v50  }
 0xee0   : > { %3228 = vperm.xlu0 %4438, %v4357_v40  }
 0xee2   : > { %3233 = vperm.xlu1 %4439, %v4358_v58  }
 0xee4   : > { %3488 = vperm.xlu0 %4438, %v3462_v52  }
 0xee6   : > { %3493 = vperm.xlu1 %4439, %v3463_v55  }
 0xee8   : > { %3218 = vperm.xlu0 %4438, %v3135_v12  }
 0xeea   : > { %3223 = vperm.xlu1 %4439, %v3138_v29  }
 0xeec   : > { %3478 = vperm.xlu0 %4438, %v3460_v51  }
 0xeee   : > { %3483 = vperm.xlu1 %4439, %v3461_v43  }
 0xef0   : > { %3644 = vperm.xlu0 %4438, %v3610_v59  }
 0xef2   : > { %3649 = vperm.xlu1 %4439, %v3611_v9  }
 0xef4   : > { %3634 = vperm.xlu0 %4438, %v3608_v48  }
 0xef6   : > { %3639 = vperm.xlu1 %4439, %v3609_v15  }
 0xef8   : > { %3624 = vperm.xlu0 %4438, %v3606_v62  }
 0xefa   : > { %3629 = vperm.xlu1 %4439, %v3607_v63  }
 0xefc   : > { %3614 = vperm.xlu0 %4438, %v3604_v24  }
 0xefe   : > { %3619 = vperm.xlu1 %4439, %v3605_v53  }
 0xf00   : > { %3757 = vperm.xlu0 %4438, %v3754_v0  }
 0xf39   : > { %v3269_v25 = vpop.permute.xlu0 %3268 }
 0xf3a   : > { %v3438_v27 = vadd.f32 %v4383_v4, %v3269_v25 }
 0xf3c   : > { %v3566_v50 = vadd.f32 %v3529_v57, %v3438_v27 }
 0xf3d   : > { %v3274_v34 = vpop.permute.xlu1 %3273  ;;  %v3259_v6 = vpop.permute.xlu0 %3258 }
 0xf3e   : > { %v3441_v29 = vadd.f32 %v4384_v39, %v3274_v34  ;;  %v3430_v52 = vadd.f32 %v3429_v28, %v3259_v6  ;;  %v3582_v15 = vmax.f32 %v3566_v50, 0.0 }
 0xf40   : > { %v3567_v13 = vadd.f32 %v3534_v21, %v3441_v29  ;;  %v3564_v62 = vadd.f32 %v3519_v37, %v3430_v52 }
 0xf41   : > { %v3264_v61 = vpop.permute.xlu1 %3263 }
 0xf42   : > { %v3433_v49 = vadd.f32 %v3432_v26, %v3264_v61  ;;  %v3583_v43 = vmax.f32 %v3567_v13, 0.0  ;;  %v3580_v57 = vmax.f32 %v3564_v62, 0.0 }
 0xf43   : > { %v3279_v8 = vpop.permute.xlu0 %3278 }
 0xf44   : > { %v3446_v41 = vadd.f32 %v3445_v56, %v3279_v8  ;;  %v3565_v59 = vadd.f32 %v3524_v20, %v3433_v49 }
 0xf45   : > { %v3289_v10 = vpop.permute.xlu1 %3288 }
 0xf46   : > { %v3454_v11 = vadd.f32 %v4387_v7, %v3289_v10  ;;  %v3568_v38 = vadd.f32 %v3539_v2, %v3446_v41  ;;  %v3581_v0 = vmax.f32 %v3565_v59, 0.0  ;;  %v3601_v2 = vpack.c.bf16 %v3583_v43, %v3582_v15 }
 0xf47   : > { %v3294_v40 = vpop.permute.xlu0 %3293 }
 0xf48   : > { %v3570_v12 = vadd.f32 %v3549_v18, %v3454_v11  ;;  %v3457_v58 = vadd.f32 %v4388_v36, %v3294_v40  ;;  %v3584_v9 = vmax.f32 %v3568_v38, 0.0 }
 0xf49   : > { %v3254_v22 = vpop.permute.xlu1 %3253 }
 0xf4a   : > { %v3571_v3 = vadd.f32 %v3554_v42, %v3457_v58  ;;  %v3586_v54 = vmax.f32 %v3570_v12, 0.0  ;;  %v3425_v63 = vadd.f32 %v4380_v17, %v3254_v22  ;;  %v3600_v17 = vpack.c.bf16 %v3581_v0, %v3580_v57 }
 0xf4b   : > { %v3249_v23 = vpop.permute.xlu0 %3248 }
 0xf4c   : > { %v3587_v5 = vmax.f32 %v3571_v3, 0.0  ;;  %v3422_v18 = vadd.f32 %v4379_v19, %v3249_v23 }
 0xf4d   : > { %v3284_v32 = vpop.permute.xlu1 %3283 }
 0xf4e   : > { %v3449_v44 = vadd.f32 %v3448_v16, %v3284_v32  ;;  %v3603_v46 = vpack.c.bf16 %v3587_v5, %v3586_v54  ;;  %v4501_v16 = vld [vmem:[%s5630_s19 + $0x8] sm:$0xff]   ;;  %v4583_v32 = vmov 0.0  }
 0xf4f   : > { %v3509_v47 = vpop.permute.xlu0 %3508  ;;  %4413 = vmatprep.subr.bf16.mxu0 %v4583_v32  ;;  %4421 = vmatprep.mubr.msk.bf16.mxu0 %vm4584_vm0, %v4583_v32 }
 0xf50   : > { %v3569_v55 = vadd.f32 %v3544_v31, %v3449_v44  ;;  %4389 = vmatprep.subr.bf16.mxu1 %v3603_v46  ;;  %v3562_v4 = vadd.f32 %v3509_v47, %v3422_v18 }
 0xf51   : > { %v3514_v51 = vpop.permute.xlu1 %3513  ;;  %4390 = vmatpush3.bf16.msra.mxu1 %v3603_v46 }
 0xf52   : > { %v3585_v48 = vmax.f32 %v3569_v55, 0.0  ;;  %v3563_v42 = vadd.f32 %v3514_v51, %v3425_v63  ;;  %v3578_v26 = vmax.f32 %v3562_v4, 0.0 }
 0xf53   : > { %v3239_v60 = vpop.permute.xlu0 %3238 }
 0xf54   : > { %v3602_v24 = vpack.c.bf16 %v3585_v48, %v3584_v9  ;;  %v3579_v39 = vmax.f32 %v3563_v42, 0.0  ;;  %v3414_v20 = vadd.f32 %v5579_v35, %v3239_v60 }
 0xf55   : > { %v3244_v53 = vpop.permute.xlu1 %3243 }
 0xf56   : > { %4391 = vmatprep.subr.bf16.mxu1 %v3602_v24  ;;  %v3417_v21 = vadd.f32 %v5581_v45, %v3244_v53  ;;  %v3599_v6 = vpack.c.bf16 %v3579_v39, %v3578_v26 }
 0xf57   : > { %4392 = vmatpush3.bf16.msra.mxu1 %v3602_v24  ;;  %v3499_v31 = vpop.permute.xlu0 %3498 }
 0xf58   : > { %4393 = vmatprep.subr.bf16.mxu1 %v3601_v2  ;;  %v3560_v19 = vadd.f32 %v3499_v31, %v3414_v20 }
 0xf59   : > { %v3504_v28 = vpop.permute.xlu1 %3503 }
 0xf5a   : > { %v3561_v37 = vadd.f32 %v3504_v28, %v3417_v21  ;;  %v3576_v45 = vmax.f32 %v3560_v19, 0.0 }
 0xf5b   : > { %4394 = vmatpush3.bf16.msra.mxu1 %v3601_v2  ;;  %v3229_v25 = vpop.permute.xlu0 %3228 }
 0xf5c   : > { %4395 = vmatprep.subr.bf16.mxu1 %v3600_v17  ;;  %v3577_v7 = vmax.f32 %v3561_v37, 0.0  ;;  %v3406_v61 = vadd.f32 %v5571_v30, %v3229_v25 }
 0xf5d   : > { %v3234_v34 = vpop.permute.xlu1 %3233 }
 0xf5e   : > { %v3409_v8 = vadd.f32 %v5575_v14, %v3234_v34  ;;  %v3598_v11 = vpack.c.bf16 %v3577_v7, %v3576_v45 }
 0xf5f   : > { %4396 = vmatpush3.bf16.msra.mxu1 %v3600_v17  ;;  %v3489_v56 = vpop.permute.xlu0 %3488 }
 0xf60   : > { %v3558_v10 = vadd.f32 %v3489_v56, %v3406_v61  ;;  %4397 = vmatprep.subr.bf16.mxu1 %v3599_v6 }
 0xf61   : > { %v3494_v35 = vpop.permute.xlu1 %3493 }
 0xf62   : > { %v3559_v36 = vadd.f32 %v3494_v35, %v3409_v8  ;;  %v3574_v12 = vmax.f32 %v3558_v10, 0.0 }
 0xf63   : > { %4398 = vmatpush3.bf16.msra.mxu1 %v3599_v6  ;;  %v3219_v40 = vpop.permute.xlu0 %3218  ;;  %v3749_v6 = vld [vmem:[%s5632_s21] sm:$0xf] }
 0xf64   : > { %v3575_v58 = vmax.f32 %v3559_v36, 0.0  ;;  %4399 = vmatprep.subr.bf16.mxu1 %v3598_v11  ;;  %v3398_v41 = vadd.f32 %v5573_v33, %v3219_v40  ;;  %v4502_v33 = vld [vmem:[%s5630_s19 + $0x10] sm:$0xff]  }
 0xf65   : > { %v3224_v29 = vpop.permute.xlu1 %3223 }
 0xf66   : > { %v3597_v22 = vpack.c.bf16 %v3575_v58, %v3574_v12  ;;  %v3401_v3 = vadd.f32 %v5577_v1, %v3224_v29  ;;  %v4503_v1 = vld [vmem:[%s5630_s19 + $0x18] sm:$0xff]  }
 0xf67   : > { %4400 = vmatpush3.bf16.msra.mxu1 %v3598_v11  ;;  %v3479_v30 = vpop.permute.xlu0 %3478 }
 0xf68   : > { %v3556_v23 = vadd.f32 %v3479_v30, %v3398_v41  ;;  %4401 = vmatprep.subr.bf16.mxu1 %v3597_v22 }
 0xf69   : > { %v3484_v14 = vpop.permute.xlu1 %3483 }
 0xf6a   : > { %v3557_v27 = vadd.f32 %v3484_v14, %v3401_v3  ;;  %v3572_v54 = vmax.f32 %v3556_v23, 0.0 }
 0xf6b   : > { %4402 = vmatpush3.bf16.msra.mxu1 %v3597_v22  ;;  %v3645_v46 = vpop.permute.xlu0 %3644 }
 0xf6c   : > { %v3573_v5 = vmax.f32 %v3557_v27, 0.0 }
 0xf6d   : > { %v3650_v38 = vpop.permute.xlu1 %3649 }
 0xf6e   : > { %v3596_v13 = vpack.c.bf16 %v3573_v5, %v3572_v54 }
 0xf6f   : > { %v3635_v51 = vpop.permute.xlu0 %3634 }
 0xf70   : > { %4403 = vmatprep.subr.bf16.mxu1 %v3596_v13 }
 0xf71   : > { %4404 = vmatpush3.bf16.msra.mxu1 %v3596_v13  ;;  %v3640_v52 = vpop.permute.xlu1 %3639 }
 0xf73   : > { %v3625_v0 = vpop.permute.xlu0 %3624 }
 0xf74   : > { %4406 = vmatmul.mubr.bf16.vlgmr.msra.gmra.mxu1 %v4501_v16 }
 0xf75   : > { %4409 = vmatprep.mubr.bf16.mxu1 %v4502_v33  ;;  %v3630_v60 = vpop.permute.xlu1 %3629 }
 0xf77   : > { %v3615_v20 = vpop.permute.xlu0 %3614 }
 0xf79   : > { %v3620_v4 = vpop.permute.xlu1 %3619 }
 0xf7b   : > { %v3758_v7 = vpop.permute.xlu0 %3757 }
 0xf7c   : > { %4410 = vmatmul.mubr.bf16.gmra.mxu1 %v4503_v1 }
0x1034   : > { %v4407_v49 = vpop.f32.mrf.mxu1 }
0x1035   : > { %v3719_v31 = vadd.f32 %v4407_v49, %v3625_v0 }
0x1036   : > { %v3710_v44 = vpop.f32.mrf.mxu1 }
0x1037   : > { %v3743_v37 = vmax.f32 %v3719_v31, 0.0  ;;  %v3711_v17 = vadd.f32 %v3710_v44, %v3615_v20 }
0x1038   : > { %v4408_v47 = vpop.f32.mrf.mxu1 }
0x1039   : > { %v3722_v18 = vadd.f32 %v4408_v47, %v3630_v60  ;;  %v3741_v19 = vmax.f32 %v3711_v17, 0.0 }
0x103a   : > { %v3713_v50 = vpop.f32.mrf.mxu1 }
0x103b   : > { %v3744_v21 = vmax.f32 %v3722_v18, 0.0  ;;  %v3714_v28 = vadd.f32 %v3713_v50, %v3620_v4 }
0x103c   : > { %v4411_v55 = vpop.f32.mrf.mxu1 }
0x103d   : > { %v3735_v59 = vadd.f32 %v4411_v55, %v3645_v46  ;;  %v3751_v25 = vpack.c.bf16 %v3744_v21, %v3743_v37  ;;  %v3742_v26 = vmax.f32 %v3714_v28, 0.0 }
0x103e   : > { %v3726_v43 = vpop.f32.mrf.mxu1 }
0x103f   : > { %v3747_v62 = vmax.f32 %v3735_v59, 0.0  ;;  %v3727_v63 = vadd.f32 %v3726_v43, %v3635_v51  ;;  %v3750_v34 = vpack.c.bf16 %v3742_v26, %v3741_v19 }
0x1040   : > { %v4412_v9 = vpop.f32.mrf.mxu1 }
0x1041   : > { %v3738_v48 = vadd.f32 %v4412_v9, %v3650_v38  ;;  %v3745_v57 = vmax.f32 %v3727_v63, 0.0 }
0x1042   : > { %v3729_v15 = vpop.f32.mrf.mxu1 }
0x1043   : > { %v3748_v24 = vmax.f32 %v3738_v48, 0.0  ;;  %v3730_v53 = vadd.f32 %v3729_v15, %v3640_v52 }
0x1045   : > { %v3753_v42 = vpack.c.bf16 %v3748_v24, %v3747_v62  ;;  %v3746_v2 = vmax.f32 %v3730_v53, 0.0 }
0x1047   : > { %4414 = vmatpush3.bf16.msra.mxu0 %v3753_v42  ;;  %v3752_v39 = vpack.c.bf16 %v3746_v2, %v3745_v57 }
0x1048   : > { %4415 = vmatprep.subr.bf16.mxu0 %v4583_v32 }
0x104b   : > { %4416 = vmatpush3.bf16.msra.mxu0 %v3752_v39 }
0x104c   : > { %4417 = vmatprep.subr.bf16.mxu0 %v4583_v32 }
0x104f   : > { %4418 = vmatpush3.bf16.msra.mxu0 %v3751_v25 }
0x1050   : > { %4419 = vmatprep.subr.bf16.mxu0 %v4583_v32 }
0x1053   : > { %4420 = vmatpush3.bf16.msra.mxu0 %v3750_v34 }
0x1056   : > { %4422 = vmatmul.mubr.msk.bf16.vlgmr.msra.gmra.mxu0 %vm982_vm2, %v3749_v6 }
0x1116   : > { %v3797_v61 = vpop.f32.mrf.mxu0 }
0x1117   : > { %v3798_v56 = vadd.f32 %v3797_v61, %v3758_v7 }
0x1118   : > { %v4423_v45 = vpop.f32.mrf.mxu0 }
0x1119   : > { %4572 = vtanh.f32 %v3798_v56 }
0x111a   : > { %v3800_v8 = vpop.f32.mrf.mxu0 }
0x111c   : > { %v4424_v10 = vpop.f32.mrf.mxu0 }
0x1126   : > { %v4573_v35 = vpop.eup %4572 }
0x1127   : > { %3804 = vst.msk [vmem:[%s732_s0] sm:$0xff] %vm982_vm2, %v4573_v35 }
0x1128 PF: > { %s34_s5 = sadd.s32 1, %s4580_s5  }
0x1129   : > { %p31_p4 = scmp.ge.s32.totalorder %s34_s5, 4  }
0x112b   :  { %33 = sbr.rel (!%p31_p4) target bundleno = 10 (0xa), region = 146 }

</bundles_post_ra>
